<compile_context>
chip_gen: v7x
topology: tpu7x:2x2x1
jax: 0.10.0
libtpu: 0.0.40
codegen_flags: <defaults>
</compile_context>

<pallas_src>
import functools
import math

import numpy as np
import jax
import jax.numpy as jnp
from jax.experimental import pallas as pl
from jax.experimental.pallas import tpu as pltpu

# ---------------------------------------------------------------------------
# Constants matching the PyTorch module
# ---------------------------------------------------------------------------
SAMPLE_RATE = 16000
N_FFT = 1024
WIN_LENGTH = 1024
HOP_LENGTH = 160
N_MELS = 128
N_FREQS = N_FFT // 2 + 1            # 513 onesided bins
N_FREQS_KEPT = N_FREQS - 1          # 512: Nyquist bin's slaney filter row is identically 0
PAD = (N_FFT - HOP_LENGTH) // 2     # 432 reflect padding
CLAMP_MIN = 1e-5

MAX_ROW_TILE = 512                  # frames (rows) per grid step, upper bound
CHUNKS_PER_FRAME = (N_FFT - 1) // HOP_LENGTH + 1   # 7


# ---------------------------------------------------------------------------
# Parameter / basis construction (host-side numpy float64)
# ---------------------------------------------------------------------------
def _hz_to_mel_slaney(hz):
    hz = np.asarray(hz, np.float64)
    f_sp = 200.0 / 3.0
    min_log_hz = 1000.0
    min_log_mel = min_log_hz / f_sp
    logstep = math.log(6.4) / 27.0
    mels = hz / f_sp
    safe_hz = np.maximum(hz, min_log_hz)                # avoid log(0) in unused branch
    log_mels = min_log_mel + np.log(safe_hz / min_log_hz) / logstep
    return np.where(hz >= min_log_hz, log_mels, mels)


def _mel_to_hz_slaney(mels):
    mels = np.asarray(mels, np.float64)
    f_sp = 200.0 / 3.0
    min_log_hz = 1000.0
    min_log_mel = min_log_hz / f_sp
    logstep = math.log(6.4) / 27.0
    freqs = f_sp * mels
    log_freqs = min_log_hz * np.exp(logstep * (mels - min_log_mel))
    return np.where(mels >= min_log_mel, log_freqs, freqs)


def _mel_filterbank_np():
    """torchaudio melscale_fbanks(norm='slaney', mel_scale='slaney'), full (513, 128)."""
    all_freqs = np.linspace(0.0, SAMPLE_RATE / 2.0, N_FREQS)        # (513,)
    m_min = _hz_to_mel_slaney(0.0)
    m_max = _hz_to_mel_slaney(SAMPLE_RATE / 2.0)
    m_pts = np.linspace(m_min, m_max, N_MELS + 2)
    f_pts = _mel_to_hz_slaney(m_pts)                                # (n_mels + 2,)

    f_diff = f_pts[1:] - f_pts[:-1]                                 # (n_mels + 1,)
    slopes = f_pts[None, :] - all_freqs[:, None]                    # (513, n_mels + 2)
    down = -slopes[:, :-2] / f_diff[:-1]
    up = slopes[:, 2:] / f_diff[1:]
    fb = np.maximum(0.0, np.minimum(down, up))                      # (513, n_mels)

    enorm = 2.0 / (f_pts[2:N_MELS + 2] - f_pts[:N_MELS])            # slaney normalization
    return fb * enorm[None, :]                                      # (513, 128) float64


def _windowed_dft_basis_np():
    """Concatenated [cos | -sin] DFT basis over bins 0..511 with periodic Hann folded in."""
    n = np.arange(N_FFT, dtype=np.float64)
    win = 0.5 * (1.0 - np.cos(2.0 * np.pi * n / N_FFT))             # torch.hann_window (periodic)
    k = np.arange(N_FREQS_KEPT, dtype=np.float64)
    ang = 2.0 * np.pi * n[:, None] * k[None, :] / N_FFT             # (n_fft, 512)
    cos_b = np.cos(ang) * win[:, None]
    sin_b = -np.sin(ang) * win[:, None]
    return np.concatenate([cos_b, sin_b], axis=1)                   # (1024, 1024) float64


@functools.lru_cache(maxsize=None)
def _device_constants():
    """Built once; bf16 MXU operands (f32 accumulation happens inside the kernel)."""
    fb_full = _mel_filterbank_np()
    # Dropping the Nyquist bin (512) is only exact because its filter row is all-zero
    # with these constants; assert so a future constant change can't silently corrupt.
    assert np.allclose(fb_full[-1], 0.0, atol=1e-6), "Nyquist fb row is not zero"
    basis = jnp.asarray(_windowed_dft_basis_np(), dtype=jnp.bfloat16)      # (1024, 1024)
    fb = jnp.asarray(fb_full[:N_FREQS_KEPT], dtype=jnp.bfloat16)           # (512, 128)
    return basis, fb


# ---------------------------------------------------------------------------
# Pallas kernel: windowed DFT -> magnitude -> mel -> log(clamp)
# ---------------------------------------------------------------------------
def logmel_kernel(frames_ref, basis_ref, fb_ref, out_ref):
    # One bf16 MXU matmul against the windowed [cos|sin] basis, f32 accumulation.
    spec = jnp.dot(frames_ref[...], basis_ref[...],
                   preferred_element_type=jnp.float32)            # (TR, 1024) f32
    re = spec[:, :N_FREQS_KEPT]
    im = spec[:, N_FREQS_KEPT:]
    mag = jnp.sqrt(re * re + im * im)                             # f32 (power = 1.0)
    mel = jnp.dot(mag.astype(jnp.bfloat16), fb_ref[...],
                  preferred_element_type=jnp.float32)             # (TR, 128) f32
    out_ref[...] = jnp.log(jnp.maximum(mel, CLAMP_MIN))
    # TODO(synk): optionally emit the (N_MELS, row_tile) transpose here and drop the
    # wrapper-side jnp.transpose (output is small; few-percent cleanup).


def _run_logmel_rows(frames_rows, basis, fb, row_tile):
    """frames_rows: (R_pad, n_fft) bf16, R_pad % row_tile == 0. Returns (R_pad, n_mels) f32."""
    rows_pad = frames_rows.shape[0]
    grid = (rows_pad // row_tile,)
    return pl.pallas_call(
        logmel_kernel,
        out_shape=jax.ShapeDtypeStruct((rows_pad, N_MELS), jnp.float32),
        grid_spec=pltpu.PrefetchScalarGridSpec(
            num_scalar_prefetch=0,
            grid=grid,
            in_specs=[
                pl.BlockSpec((row_tile, N_FFT), lambda i: (i, 0)),
                # basis / fb index_maps are constant -> fetched once, revisited thereafter.
                pl.BlockSpec((N_FFT, 2 * N_FREQS_KEPT), lambda i: (0, 0)),
                pl.BlockSpec((N_FREQS_KEPT, N_MELS), lambda i: (0, 0)),
            ],
            out_specs=pl.BlockSpec((row_tile, N_MELS), lambda i: (i, 0)),
        ),
        compiler_params=pltpu.CompilerParams(
            dimension_semantics=("parallel",),
            # ~12 MiB actually used at row_tile=512 with bf16 operands; 32 MiB is v7x-safe.
            vmem_limit_bytes=32 << 20,
        ),
    )(frames_rows, basis, fb)


# ---------------------------------------------------------------------------
# Full forward: reflect pad + framing (XLA glue), then Pallas hot path
# ---------------------------------------------------------------------------
def _round_up(x, m):
    return ((x + m - 1) // m) * m


def _choose_row_tile(rows):
    # At least 2 grid steps whenever possible (feeds both v7x TensorCores); tile capped
    # at 512 frames (amortizes per-step overhead, stays well inside VMEM in bf16).
    n_tiles = max(2, -(-rows // MAX_ROW_TILE))
    tile = _round_up(-(-rows // n_tiles), 16)        # multiple of 16 (bf16 sublane packing)
    return max(16, min(MAX_ROW_TILE, tile))


def _forward(wav, basis, fb):
    wav = wav.astype(jnp.float32)
    b, t = wav.shape
    if t <= PAD:
        raise ValueError(f"reflect padding requires T > {PAD}, got T={t}")

    # F.pad(wav, (PAD, PAD), 'reflect')
    padded = jnp.pad(wav, ((0, 0), (PAD, PAD)), mode="reflect")
    t_pad = t + 2 * PAD
    num_frames = 1 + (t_pad - N_FFT) // HOP_LENGTH                # center=False

    # All framing traffic in bf16 (MXU operand dtype) to cut the expanded-frame HBM bytes.
    # TODO(synk): move framing fully into the kernel (pl.ANY padded wav + make_async_copy
    # of the contiguous (row_tile-1)*HOP + N_FFT span per tile) to remove the expansion.
    padded = padded.astype(jnp.bfloat16)

    # Framing via hop-sized chunks + shifted slices (no XLA gather).
    n_chunks = num_frames + CHUNKS_PER_FRAME - 1
    needed = n_chunks * HOP_LENGTH
    if needed > t_pad:
        padded = jnp.pad(padded, ((0, 0), (0, needed - t_pad)))
    chunks = padded[:, :needed].reshape(b, n_chunks, HOP_LENGTH)
    frames = jnp.concatenate(
        [chunks[:, k:k + num_frames, :] for k in range(CHUNKS_PER_FRAME)], axis=-1
    )[:, :, :N_FFT]                                               # (B, num_frames, n_fft) bf16

    # Flatten rows; pad row count to a multiple of the row tile.
    rows = b * num_frames
    row_tile = _choose_row_tile(rows)
    rows_pad = _round_up(rows, row_tile)
    frames_rows = frames.reshape(rows, N_FFT)
    if rows_pad != rows:
        frames_rows = jnp.pad(frames_rows, ((0, rows_pad - rows), (0, 0)))

    out_rows = _run_logmel_rows(frames_rows, basis, fb, row_tile)  # (rows_pad, n_mels) f32
    out = out_rows[:rows].reshape(b, num_frames, N_MELS)
    return jnp.transpose(out, (0, 2, 1))                           # (B, n_mels, num_frames)


_forward_jit = jax.jit(_forward)


def log_mel_spectrogram(wav):
    """wav: (B, T) float32  ->  logmel: (B, n_mels, num_frames) float32."""
    basis, fb = _device_constants()
    return _forward_jit(wav, basis, fb)


# ---------------------------------------------------------------------------
# Self-test
# ---------------------------------------------------------------------------
if __name__ == "__main__":
    key = jax.random.PRNGKey(0)
    B, T = 2, 1600                     # small, but > reflect-pad requirement (T > 432)
    wav = jax.random.normal(key, (B, T), dtype=jnp.float32)

    logmel = log_mel_spectrogram(wav)
    jax.block_until_ready(logmel)

    expected_frames = 1 + (T + 2 * PAD - N_FFT) // HOP_LENGTH   # 10
    assert logmel.shape == (B, N_MELS, expected_frames), logmel.shape
    assert logmel.dtype == jnp.float32
    assert bool(jnp.all(jnp.isfinite(logmel)))

    # Pure-JAX f32 reference (gather framing + rfft + full 513-bin slaney fbank).
    padded_ref = jnp.pad(wav, ((0, 0), (PAD, PAD)), mode="reflect")
    idx = (jnp.arange(expected_frames)[:, None] * HOP_LENGTH
           + jnp.arange(N_FFT)[None, :])
    frames_ref = padded_ref[:, idx]                               # (B, F, n_fft) f32
    n = np.arange(N_FFT, dtype=np.float64)
    win = jnp.asarray(0.5 * (1.0 - np.cos(2.0 * np.pi * n / N_FFT)), jnp.float32)
    stft = jnp.fft.rfft(frames_ref * win, axis=-1)                # (B, F, 513)
    mag_ref = jnp.abs(stft).astype(jnp.float32)
    fb_full = jnp.asarray(_mel_filterbank_np(), jnp.float32)      # (513, 128)
    ref = jnp.log(jnp.maximum(mag_ref @ fb_full, CLAMP_MIN))
    ref = jnp.transpose(ref, (0, 2, 1))                           # (B, n_mels, F)

    max_err = float(jnp.max(jnp.abs(logmel - ref)))
    # bf16 matmul operands vs f32 reference: typical max abs err ~0.02 on log-mel values.
    assert max_err < 0.3, f"bf16 kernel vs f32 reference max abs err {max_err}"

    print("KERNEL_OK")
</pallas_src>

<mosaic_0001>
module attributes {stable_mosaic.version = 11 : i64} {
  func.func @logmel_kernel(%arg0: i32, %arg1: memref<16x1024xbf16, #tpu.memory_space<vmem>>, %arg2: memref<1024x1024xbf16, #tpu.memory_space<vmem>>, %arg3: memref<512x128xbf16, #tpu.memory_space<vmem>>, %arg4: memref<16x128xf32, #tpu.memory_space<vmem>>) attributes {dimension_semantics = [#tpu.dimension_semantics<parallel>], iteration_bounds = array<i64: 2>, scalar_prefetch = 0 : i64, scratch_operands = 0 : i64, tpu.core_type = #tpu.core_type<tc>, window_params = [{transform_indices = @transform_0, window_bounds = array<i64: 16, 1024>}, {pipeline_mode = #tpu.pipeline_mode<synchronous>, transform_indices = @transform_1, window_bounds = array<i64: 1024, 1024>}, {pipeline_mode = #tpu.pipeline_mode<synchronous>, transform_indices = @transform_2, window_bounds = array<i64: 512, 128>}, {transform_indices = @transform_3, window_bounds = array<i64: 16, 128>}]} {
    %c0 = arith.constant 0 : index
    %c0_0 = arith.constant 0 : index
    %0 = vector.load %arg1[%c0, %c0_0] : memref<16x1024xbf16, #tpu.memory_space<vmem>>, vector<16x1024xbf16>
    %c0_1 = arith.constant 0 : index
    %c0_2 = arith.constant 0 : index
    %1 = vector.load %arg2[%c0_1, %c0_2] : memref<1024x1024xbf16, #tpu.memory_space<vmem>>, vector<1024x1024xbf16>
    %cst = arith.constant dense<0.000000e+00> : vector<16x1024xf32>
    %2 = tpu.matmul %0, %1, %cst {dimension_numbers = #tpu.dot_dimension_numbers<[1], [0], [0], [1], [0, 0, 1, 1], [], []>} : vector<16x1024xbf16>, vector<1024x1024xbf16>, vector<16x1024xf32> -> vector<16x1024xf32>
    %3 = vector.extract_strided_slice %2 {offsets = [0, 0], sizes = [16, 512], strides = [1, 1]} : vector<16x1024xf32> to vector<16x512xf32>
    %4 = vector.extract_strided_slice %2 {offsets = [0, 512], sizes = [16, 512], strides = [1, 1]} : vector<16x1024xf32> to vector<16x512xf32>
    %5 = arith.mulf %3, %3 : vector<16x512xf32>
    %6 = arith.mulf %4, %4 : vector<16x512xf32>
    %7 = arith.addf %5, %6 : vector<16x512xf32>
    %8 = math.sqrt %7 : vector<16x512xf32>
    %9 = arith.truncf %8 : vector<16x512xf32> to vector<16x512xbf16>
    %c0_3 = arith.constant 0 : index
    %c0_4 = arith.constant 0 : index
    %10 = vector.load %arg3[%c0_3, %c0_4] : memref<512x128xbf16, #tpu.memory_space<vmem>>, vector<512x128xbf16>
    %cst_5 = arith.constant dense<0.000000e+00> : vector<16x128xf32>
    %11 = tpu.matmul %9, %10, %cst_5 {dimension_numbers = #tpu.dot_dimension_numbers<[1], [0], [0], [1], [0, 0, 1, 1], [], []>} : vector<16x512xbf16>, vector<512x128xbf16>, vector<16x128xf32> -> vector<16x128xf32>
    %cst_6 = arith.constant 9.99999974E-6 : f32
    %12 = vector.broadcast %cst_6 : f32 to vector<16x128xf32>
    %13 = arith.maximumf %11, %12 : vector<16x128xf32>
    %14 = math.log %13 : vector<16x128xf32>
    %c0_7 = arith.constant 0 : index
    %c0_8 = arith.constant 0 : index
    %15 = vector.load %arg4[%c0_7, %c0_8] : memref<16x128xf32, #tpu.memory_space<vmem>>, vector<16x128xf32>
    tpu.vector_store %arg4[%c0_7, %c0_8], %14 {strides = array<i32>} : memref<16x128xf32, #tpu.memory_space<vmem>>, vector<16x128xf32>,
    return
  }
  func.func @transform_0(%arg0: i32) -> (i32, i32) {
    %c0_i32 = arith.constant 0 : i32
    %c0_i32_0 = arith.constant 0 : i32
    return %arg0, %c0_i32 : i32, i32
  }
  func.func @transform_1(%arg0: i32) -> (i32, i32) {
    %c0_i32 = arith.constant 0 : i32
    %c0_i32_0 = arith.constant 0 : i32
    %c0_i32_1 = arith.constant 0 : i32
    return %c0_i32, %c0_i32_0 : i32, i32
  }
  func.func @transform_2(%arg0: i32) -> (i32, i32) {
    %c0_i32 = arith.constant 0 : i32
    %c0_i32_0 = arith.constant 0 : i32
    %c0_i32_1 = arith.constant 0 : i32
    return %c0_i32, %c0_i32_0 : i32, i32
  }
  func.func @transform_3(%arg0: i32) -> (i32, i32) {
    %c0_i32 = arith.constant 0 : i32
    %c0_i32_0 = arith.constant 0 : i32
    return %arg0, %c0_i32 : i32, i32
  }
}

</mosaic_0001>

<bundles_post_ra>
// kernel: reverse.1
= control target key start
LH: loop header
LB: loop body
LE: loop exit
PB: predicated region body
PF: predicated region fallthrough
CT: control target
= control target key end

     0   :  { %v2_v0 = vlaneseq  ;;  %s305_s0 = inlined_call_operand.vmem [shape: bf16[2,512], index: 0, kind: input, shape index: {}]   ;;  %s306_s1 = inlined_call_operand.vmem [shape: bf16[2,512], index: 1, kind: output, shape index: {}]  }
   0x2   :  { %v3_v1 = vsub.s32 127, %v2_v0 }
   0x4   :  { %4 = vset.pattern.permute.xlu0 %v3_v1 }
   0x5   :  { %s265_s6 = smov 0   ;;  %s267_s7 = smov 0  }
   0x6   :  { %s269_s8 = smov 0  }
   0x7 LB: > { %s199_s9 = sadd.s32 4294967295, %s252_s8   ;;  %s19_s10 = sadd.s32 1, %s248_s7  ;;  %s252_s8 = sphi %s269_s8, %s10_s8   ;;  %s248_s7 = sphi %s267_s7, %s308_s7   ;;  %s244_s6 = sphi %s265_s6, %s307_s6  }
   0x8   : > { %p20_p0 = scmp.ge.s32.totalorder %s19_s10, 4  ;;  %p201_p1 = scmp.ge.s32.totalorder %s252_s8, 4 }
   0x9   : > { %s38_s11 = sand.u32 (!%p201_p1), 1, %s252_s8   ;;  %s40_s12 = ssub.s32 (!%p201_p1), 3, %s248_s7 }
   0xa   : > { %s310_s10 = smov (%p20_p0, %s19_s10), 0  ;;  %36 = sbr.rel (%p201_p1) target bundleno = 17 (0x11), region = 16 }
   0xb   : > { %s43_s15 = scalar_lea.vmem (!%p201_p1), %s305_s0, %s40_s12  ;;  %s39_s16 = scalar_lea.vmem (!%p201_p1), [#allocation1], %s38_s11 }
   0xc   : > { %v59_v2 = vld [vmem:[%s43_s15] sm:$0x1] (!%p201_p1) }
   0xd   : > { %60 = vst [vmem:[%s39_s16] sm:$0x1] (!%p201_p1), %v59_v2 }
  0x11 PF: > { %p202_p2 = scmp.ge.s32.totalorder %s252_s8, 1  ;;  %p76_p3 = scmp.lt.s32.totalorder %s252_s8, 5 }
  0x13   : > { %p77_p4 = pnand %p202_p2, %p76_p3 }
  0x14   : > { %s86_s17 = sand.u32 (!%p77_p4), 1, %s199_s9   ;;  %v254_v8 = vmov (!%p77_p4), 0.0   ;;  %s125_s22 = scalar_lea.vmem (!%p77_p4), %s306_s1, %s244_s6 }
  0x15   : > { %80 = sbr.rel (%p77_p4) target bundleno = 180 (0xb4), region = 50  ;;  %s87_s18 = scalar_lea.vmem (!%p77_p4), [#allocation1], %s86_s17 }
  0x16   : > { %v103_v3 = vld [vmem:[%s87_s18] sm:$0x1] (!%p77_p4)  ;;  %s90_s19 = scalar_lea.vmem (!%p77_p4), [#allocation3], %s86_s17 }
  0x17   : > { %v104_v4 = vunpack.c.l.bf16 (!%p77_p4), %v103_v3 }
  0x19   : > { %106 = vst [vmem:[#allocation0] sm:$0x3] (!%p77_p4), %v104_v4 }
  0x20   : > { %v108_v5 = vld [vmem:[#allocation0] sm:$0xff] }
  0x21   : > { %109 = vperm.xlu0 %4, %v108_v5  }
  0xa0   : > { %v110_v6 = vpop.permute.xlu0 %109 }
  0xa1   : > { %111 = vst [vmem:[#allocation2] sm:$0xff] %v110_v6 }
  0xa8   : > { %v116_v7 = vld [vmem:[#allocation2] sm:$0x3] }
  0xa9   : > { %v117_v9 = vpack.c.bf16 %v254_v8, %v116_v7 }
  0xab   : > { %119 = vst [vmem:[%s90_s19] sm:$0x1] %v117_v9 }
  0xb2   : > { %v141_v10 = vld [vmem:[%s90_s19] sm:$0x1] }
  0xb3   : > { %142 = vst [vmem:[%s125_s22] sm:$0x1] %v141_v10 }
  0xb4 PF: > { %s10_s8 = sadd.s32 1, %s252_s8   ;;  %s307_s6 = smov %s248_s7 }
  0xb5   : > { %p7_p5 = scmp.ge.s32.totalorder %s10_s8, 6   ;;  %s308_s7 = smov %s310_s10 }
  0xb7   :  { %9 = sbr.rel (!%p7_p5) target bundleno = 7 (0x7), region = 110 }

// kernel: _forward.1
= control target key start
LH: loop header
LB: loop body
LE: loop exit
PB: predicated region body
PF: predicated region fallthrough
CT: control target
= control target key end

     0   :  { %8 = vsyncpa [#allocation3], 0  ;;  %s5660_s0 = inlined_call_operand.vmem [shape: bf16[32,1024], index: 0, kind: input, shape index: {}]   ;;  %s5661_s1 = inlined_call_operand.hbm [shape: bf16[1024,1024], index: 1, kind: input, shape index: {}]   ;;  %s5662_s2 = inlined_call_operand.hbm [shape: bf16[512,128], index: 2, kind: input, shape index: {}]   ;;  %s5663_s3 = inlined_call_operand.vmem [shape: f32[32,128], index: 3, kind: output, shape index: {}]  }
   0x1   :  { %9 = vsyncpa [#allocation5], 0  ;;  %s5368_s12 = smov 0  }
   0x2 LB: > { %s5342_s13 = smov [#allocation2]   ;;  %s4524_s15 = sadd.s32 4294967295, %s5340_s12   ;;  %s5340_s12 = sphi %s5368_s12, %s15_s12  }
   0x3   : > { %s126_s14 = sshll.u32 %s5342_s13, 4  ;;  %p4526_p0 = scmp.ge.s32.totalorder %s5340_s12, 1  ;;  %s127_s14 = int_to_ptr.vmem [resolvable:$true] %s126_s14 }
   0x4   : > { %p114_p1 = scmp.lt.s32.totalorder %s5340_s12, 3  ;;  %p5382_p3 = scmp.eq.s32.totalorder %s4524_s15, 0 }
   0x5   : > { %s5343_s18 = smov [#allocation4]   ;;  %s5270_s23 = scalar_lea.hbm %s5661_s1, 65536 }
   0x6   : > { %p5376_p2 = pnand %p4526_p0, %p114_p1  ;;  %s139_s19 = sshll.u32 %s5343_s18, 4  ;;  %s5394_s19 = int_to_ptr.vmem [resolvable:$true] %s139_s19 }
   0x7   : > { %s5668_s17 = scalar_select %p5382_p3, 1, 0 }
   0x8   : > { %s5667_s16 = scalar_select %p5376_p2, 1, 0 }
   0x9   : > { %p5193_p4 = pneg %p5376_p2  ;;  %p5271_p6 = scmp.ne.s32.totalorder %s5661_s1, %s5270_s23 }
   0xa   : > { %p5277_p10 = scmp.lt.u32.totalorder %s5270_s23, %s5661_s1 }
   0xb   : > { %p5390_p5 = pnand %p5382_p3, %p5193_p4 }
   0xd   : > { %p5272_p7 = pneg %p5390_p5 }
   0xf   : > { %p5273_p8 = pnand %p5272_p7, %p5271_p6 }
  0x11   : > { %p5274_p9 = pneg %p5273_p8 }
  0x13   : > { %p5279_p11 = pnand %p5277_p10, %p5274_p9 }
  0x15   : > { %5282 = shalt.err (!%p5279_p11)
}
  0x16   : > { %s5283_s28 = scalar_lea.vmem %s127_s14, 65536  ;;  %p5291_p1 = scmp.lt.s32.totalorder %s127_s14, %s127_s14 }
  0x17   : > { %p5284_p12 = scmp.ne.s32.totalorder %s127_s14, %s5283_s28  ;;  %p5292_p4 = scmp.lt.s32.totalorder %s5283_s28, %s5283_s28 }
  0x19   : > { %p5286_p13 = pnand %p5284_p12, %p5272_p7  ;;  %p5293_p3 = por %p5292_p4, %p5291_p1 }
  0x1b   : > { %p5287_p0 = pneg %p5286_p13 }
  0x1d   : > { %p5294_p2 = pnand %p5293_p3, %p5287_p0 }
  0x1f   : > { %5297 = shalt.err (!%p5294_p2)
}
  0x20   : > { %s5344_s29 = smov 512   ;;  %s5345_s30 = smov 32  }
  0x21   : > { %5196 = dma.hbm_to_vmem [thread:$0]  (!%p5390_p5), %s5661_s1, 65536, %s127_s14, [#allocation3], %s5344_s29, %s5344_s29, %s5345_s30  }
  0x22   : > { %s5298_s8 = scalar_lea.hbm %s5662_s2, 4096 }
  0x23   : > { %p5299_p6 = scmp.ne.s32.totalorder %s5662_s2, %s5298_s8  ;;  %p5305_p8 = scmp.lt.u32.totalorder %s5298_s8, %s5662_s2 }
  0x25   : > { %p5301_p2 = pnand %p5299_p6, %p5272_p7 }
  0x27   : > { %p5302_p3 = pneg %p5301_p2 }
  0x29   : > { %p5307_p9 = pnand %p5305_p8, %p5302_p3 }
  0x2b   : > { %5310 = shalt.err (!%p5307_p9)
}
  0x2c   : > { %s5311_s14 = scalar_lea.vmem %s5394_s19, 4096  ;;  %p5319_p13 = scmp.lt.s32.totalorder %s5394_s19, %s5394_s19 }
  0x2d   : > { %p5312_p10 = scmp.ne.s32.totalorder %s5394_s19, %s5311_s14  ;;  %p5320_p0 = scmp.lt.s32.totalorder %s5311_s14, %s5311_s14 }
  0x2f   : > { %p5314_p11 = pnand %p5312_p10, %p5272_p7  ;;  %p5321_p1 = por %p5320_p0, %p5319_p13 }
  0x31   : > { %p5315_p12 = pneg %p5314_p11 }
  0x33   : > { %p5322_p4 = pnand %p5321_p1, %p5315_p12 }
  0x35   : > { %5325 = shalt.err (!%p5322_p4)
}
  0x36   : > { %s5346_s18 = smov 64   ;;  %s5347_s21 = smov 4  }
  0x37   : > { %5199 = dma.hbm_to_vmem [thread:$0]  (!%p5390_p5), %s5662_s2, 4096, %s5394_s19, [#allocation5], %s5346_s18, %s5346_s18, %s5347_s21  }
  0x38   : > { %p5670_p6 = scmp.ne.s32.totalorder %s5667_s16, 0 }
  0x39   : > { %p5671_p7 = scmp.ne.s32.totalorder (!%p5670_p6), %s5668_s17, 0 }
  0x3a   : > { %165 = sbr.rel (%p5670_p6) target bundleno = 1060 (0x424), region = 32 }
  0x41   : > { %5331 = dma.done.wait (%p5671_p7), [#allocation3], 65536  }
  0x42   : > { %5333 = vsyncadd (%p5671_p7), [#allocation3], 4294901760 }
  0x43   : > { %5335 = dma.done.wait (%p5671_p7), [#allocation5], 4096  }
  0x44   : > { %5337 = vsyncadd (%p5671_p7), [#allocation5], 4294963200  ;;  %v216_v0 = vld [vmem:[#allocation2] sm:$0xff]  ;;  %v217_v2 = vld [vmem:[#allocation2 + $0x8] sm:$0xff]  ;;  %s4533_s16 = sshll.u32 %s4524_s15, 1 }
  0x45   : > { %v220_v1 = vld [vmem:[#allocation2 + $0x20] sm:$0xff]  ;;  %v221_v4 = vld [vmem:[#allocation2 + $0x28] sm:$0xff]  ;;  %p195_p5 = scmp.lt.s32.totalorder %s4533_s16, 3 }
  0x46   : > { %v4547_v3 = vcombine.high %v216_v0, %v220_v1  ;;  %v4546_v5 = vcombine.low %v216_v0, %v220_v1  ;;  %v224_v6 = vld [vmem:[#allocation2 + $0x40] sm:$0xff]  ;;  %v4549_v8 = vcombine.high %v217_v2, %v221_v4  ;;  %v4548_v9 = vcombine.low %v217_v2, %v221_v4  ;;  %v225_v11 = vld [vmem:[#allocation2 + $0x48] sm:$0xff] }
  0x47   : > { %v228_v7 = vld [vmem:[#allocation2 + $0x60] sm:$0xff]  ;;  %v229_v12 = vld [vmem:[#allocation2 + $0x68] sm:$0xff]  ;;  %s5673_s16 = smov (!%p195_p5, %s4533_s16), 3 }
  0x48   : > { %v4555_v10 = vcombine.high %v224_v6, %v228_v7  ;;  %v232_v13 = vld [vmem:[#allocation2 + $0x80] sm:$0xff]  ;;  %3328 = vmatprep.subr.bf16.mxu0 %v4547_v3  ;;  %v4557_v14 = vcombine.high %v225_v11, %v229_v12  ;;  %v233_v16 = vld [vmem:[#allocation2 + $0x88] sm:$0xff]  ;;  %3500 = vmatprep.subr.bf16.mxu1 %v4549_v8  ;;  %v4554_v18 = vcombine.low %v224_v6, %v228_v7  ;;  %s5092_s15 = sshll.u32 %s5673_s16, 5  ;;  %s4537_s24 = sshll.u32 %s5673_s16, 3 }
  0x49   : > { %v236_v15 = vld [vmem:[#allocation2 + $0xa0] sm:$0xff]  ;;  %v237_v17 = vld [vmem:[#allocation2 + $0xa8] sm:$0xff]  ;;  %3329 = vmatpush1.bf16.msra.mxu0 %v4546_v5  ;;  %3501 = vmatpush1.bf16.msra.mxu1 %v4548_v9  ;;  %v4556_v19 = vcombine.low %v225_v11, %v229_v12  ;;  %s5461_s20 = scalar_lea.vmem %s5660_s0, %s5092_s15  ;;  %s205_s27 = scalar_lea.vmem %s5663_s3, %s4537_s24 }
  0x4a   : > { %3330 = vmatprep.subr.bf16.mxu0 %v4555_v10  ;;  %v4563_v20 = vcombine.high %v232_v13, %v236_v15  ;;  %3502 = vmatprep.subr.bf16.mxu1 %v4557_v14  ;;  %v4565_v21 = vcombine.high %v233_v16, %v237_v17  ;;  %v240_v22 = vld [vmem:[#allocation2 + $0xc0] sm:$0xff]  ;;  %v241_v24 = vld [vmem:[#allocation2 + $0xc8] sm:$0xff]  ;;  %v4562_v26 = vcombine.low %v232_v13, %v236_v15 }
  0x4b   : > { %v244_v23 = vld [vmem:[#allocation2 + $0xe0] sm:$0xff]  ;;  %v245_v25 = vld [vmem:[#allocation2 + $0xe8] sm:$0xff]  ;;  %v4564_v27 = vcombine.low %v233_v16, %v237_v17 }
  0x4c   : > { %v4571_v28 = vcombine.high %v240_v22, %v244_v23  ;;  %v4573_v29 = vcombine.high %v241_v24, %v245_v25  ;;  %v248_v30 = vld [vmem:[#allocation2 + $0x100] sm:$0xff]  ;;  %v249_v32 = vld [vmem:[#allocation2 + $0x108] sm:$0xff]  ;;  %v4570_v34 = vcombine.low %v240_v22, %v244_v23  ;;  %v4572_v35 = vcombine.low %v241_v24, %v245_v25 }
  0x4d   : > { %3331 = vmatpush1.bf16.msra.mxu0 %v4554_v18  ;;  %3503 = vmatpush1.bf16.msra.mxu1 %v4556_v19  ;;  %v252_v31 = vld [vmem:[#allocation2 + $0x120] sm:$0xff]  ;;  %v253_v33 = vld [vmem:[#allocation2 + $0x128] sm:$0xff] }
  0x4e   : > { %3332 = vmatprep.subr.bf16.mxu0 %v4563_v20  ;;  %3504 = vmatprep.subr.bf16.mxu1 %v4565_v21  ;;  %v4579_v36 = vcombine.high %v248_v30, %v252_v31  ;;  %v4581_v37 = vcombine.high %v249_v32, %v253_v33  ;;  %v256_v38 = vld [vmem:[#allocation2 + $0x140] sm:$0xff]  ;;  %v257_v40 = vld [vmem:[#allocation2 + $0x148] sm:$0xff]  ;;  %v4578_v42 = vcombine.low %v248_v30, %v252_v31 }
  0x4f   : > { %v260_v39 = vld [vmem:[#allocation2 + $0x160] sm:$0xff]  ;;  %v261_v41 = vld [vmem:[#allocation2 + $0x168] sm:$0xff]  ;;  %v4580_v43 = vcombine.low %v249_v32, %v253_v33 }
  0x50   : > { %v4587_v44 = vcombine.high %v256_v38, %v260_v39  ;;  %v4589_v45 = vcombine.high %v257_v40, %v261_v41  ;;  %v264_v46 = vld [vmem:[#allocation2 + $0x180] sm:$0xff]  ;;  %v265_v48 = vld [vmem:[#allocation2 + $0x188] sm:$0xff]  ;;  %v4586_v50 = vcombine.low %v256_v38, %v260_v39  ;;  %v4588_v51 = vcombine.low %v257_v40, %v261_v41 }
  0x51   : > { %3333 = vmatpush1.bf16.msra.mxu0 %v4562_v26  ;;  %3505 = vmatpush1.bf16.msra.mxu1 %v4564_v27  ;;  %v268_v47 = vld [vmem:[#allocation2 + $0x1a0] sm:$0xff]  ;;  %v269_v49 = vld [vmem:[#allocation2 + $0x1a8] sm:$0xff] }
  0x52   : > { %3334 = vmatprep.subr.bf16.mxu0 %v4571_v28  ;;  %3506 = vmatprep.subr.bf16.mxu1 %v4573_v29  ;;  %v4595_v52 = vcombine.high %v264_v46, %v268_v47  ;;  %v5464_v53 = vld [vmem:[%s5461_s20] sm:$0xff]  ;;  %v4597_v55 = vcombine.high %v265_v48, %v269_v49  ;;  %v273_v59 = vld [vmem:[#allocation2 + $0x1c8] sm:$0xff]  ;;  %v4594_v61 = vcombine.low %v264_v46, %v268_v47 }
  0x53   : > { %v5467_v54 = vld [vmem:[%s5461_s20 + $0x20] sm:$0xff]  ;;  %v277_v60 = vld [vmem:[#allocation2 + $0x1e8] sm:$0xff]  ;;  %v4596_v62 = vcombine.low %v265_v48, %v269_v49 }
  0x54   : > { %v272_v56 = vld [vmem:[#allocation2 + $0x1c0] sm:$0xff]  ;;  %v5471_v58 = vcombine.high %v5464_v53, %v5467_v54  ;;  %v4605_v0 = vcombine.high %v273_v59, %v277_v60  ;;  %v281_v3 = vld [vmem:[#allocation2 + $0x208] sm:$0xff]  ;;  %v4604_v6 = vcombine.low %v273_v59, %v277_v60 }
  0x55   : > { %3335 = vmatpush1.bf16.msra.mxu0 %v4570_v34  ;;  %3507 = vmatpush1.bf16.msra.mxu1 %v4572_v35  ;;  %v276_v57 = vld [vmem:[#allocation2 + $0x1e0] sm:$0xff]  ;;  %v285_v4 = vld [vmem:[#allocation2 + $0x228] sm:$0xff] }
  0x56   : > { %3336 = vmatprep.subr.bf16.mxu0 %v4579_v36  ;;  %3508 = vmatprep.subr.bf16.mxu1 %v4581_v37  ;;  %v4603_v63 = vcombine.high %v272_v56, %v276_v57  ;;  %v280_v1 = vld [vmem:[#allocation2 + $0x200] sm:$0xff]  ;;  %v4602_v5 = vcombine.low %v272_v56, %v276_v57  ;;  %v4613_v8 = vcombine.high %v281_v3, %v285_v4  ;;  %v289_v11 = vld [vmem:[#allocation2 + $0x248] sm:$0xff] }
  0x57   : > { %3360 = vmatprep.mubr.bf16.mxu0 %v5471_v58  ;;  %v284_v2 = vld [vmem:[#allocation2 + $0x220] sm:$0xff]  ;;  %3532 = vmatprep.mubr.bf16.mxu1 %v5471_v58  ;;  %v293_v12 = vld [vmem:[#allocation2 + $0x268] sm:$0xff]  ;;  %v4612_v14 = vcombine.low %v281_v3, %v285_v4 }
  0x58   : > { %v4611_v7 = vcombine.high %v280_v1, %v284_v2  ;;  %v288_v9 = vld [vmem:[#allocation2 + $0x240] sm:$0xff]  ;;  %v4610_v13 = vcombine.low %v280_v1, %v284_v2  ;;  %v4621_v16 = vcombine.high %v289_v11, %v293_v12  ;;  %v297_v19 = vld [vmem:[#allocation2 + $0x288] sm:$0xff]  ;;  %v4620_v22 = vcombine.low %v289_v11, %v293_v12 }
  0x59   : > { %3337 = vmatpush1.bf16.msra.mxu0 %v4578_v42  ;;  %3509 = vmatpush1.bf16.msra.mxu1 %v4580_v43  ;;  %v292_v10 = vld [vmem:[#allocation2 + $0x260] sm:$0xff]  ;;  %v301_v20 = vld [vmem:[#allocation2 + $0x2a8] sm:$0xff] }
  0x5a   : > { %3338 = vmatprep.subr.bf16.mxu0 %v4587_v44  ;;  %3510 = vmatprep.subr.bf16.mxu1 %v4589_v45  ;;  %v4619_v15 = vcombine.high %v288_v9, %v292_v10  ;;  %v296_v17 = vld [vmem:[#allocation2 + $0x280] sm:$0xff]  ;;  %v4618_v21 = vcombine.low %v288_v9, %v292_v10  ;;  %v4629_v24 = vcombine.high %v297_v19, %v301_v20  ;;  %v305_v27 = vld [vmem:[#allocation2 + $0x2c8] sm:$0xff] }
  0x5b   : > { %v300_v18 = vld [vmem:[#allocation2 + $0x2a0] sm:$0xff]  ;;  %v309_v28 = vld [vmem:[#allocation2 + $0x2e8] sm:$0xff]  ;;  %v4628_v30 = vcombine.low %v297_v19, %v301_v20 }
  0x5c   : > { %v4627_v23 = vcombine.high %v296_v17, %v300_v18  ;;  %v304_v25 = vld [vmem:[#allocation2 + $0x2c0] sm:$0xff]  ;;  %v4626_v29 = vcombine.low %v296_v17, %v300_v18  ;;  %v4637_v32 = vcombine.high %v305_v27, %v309_v28  ;;  %v313_v35 = vld [vmem:[#allocation2 + $0x308] sm:$0xff]  ;;  %v4636_v38 = vcombine.low %v305_v27, %v309_v28 }
  0x5d   : > { %3339 = vmatpush1.bf16.msra.mxu0 %v4586_v50  ;;  %3511 = vmatpush1.bf16.msra.mxu1 %v4588_v51  ;;  %v308_v26 = vld [vmem:[#allocation2 + $0x2e0] sm:$0xff]  ;;  %v317_v36 = vld [vmem:[#allocation2 + $0x328] sm:$0xff] }
  0x5e   : > { %3340 = vmatprep.subr.bf16.mxu0 %v4595_v52  ;;  %3512 = vmatprep.subr.bf16.mxu1 %v4597_v55  ;;  %v4635_v31 = vcombine.high %v304_v25, %v308_v26  ;;  %v312_v33 = vld [vmem:[#allocation2 + $0x300] sm:$0xff]  ;;  %v4634_v37 = vcombine.low %v304_v25, %v308_v26  ;;  %v4645_v40 = vcombine.high %v313_v35, %v317_v36  ;;  %v321_v43 = vld [vmem:[#allocation2 + $0x348] sm:$0xff] }
  0x5f   : > { %v316_v34 = vld [vmem:[#allocation2 + $0x320] sm:$0xff]  ;;  %v325_v44 = vld [vmem:[#allocation2 + $0x368] sm:$0xff]  ;;  %v4644_v46 = vcombine.low %v313_v35, %v317_v36 }
  0x60   : > { %v4643_v39 = vcombine.high %v312_v33, %v316_v34  ;;  %v320_v41 = vld [vmem:[#allocation2 + $0x340] sm:$0xff]  ;;  %v4642_v45 = vcombine.low %v312_v33, %v316_v34  ;;  %v4653_v48 = vcombine.high %v321_v43, %v325_v44  ;;  %v329_v51 = vld [vmem:[#allocation2 + $0x388] sm:$0xff]  ;;  %v4652_v56 = vcombine.low %v321_v43, %v325_v44 }
  0x61   : > { %3341 = vmatpush1.bf16.msra.mxu0 %v4594_v61  ;;  %3513 = vmatpush1.bf16.msra.mxu1 %v4596_v62  ;;  %v324_v42 = vld [vmem:[#allocation2 + $0x360] sm:$0xff]  ;;  %v333_v52 = vld [vmem:[#allocation2 + $0x3a8] sm:$0xff] }
  0x62   : > { %3342 = vmatprep.subr.bf16.mxu0 %v4603_v63  ;;  %3514 = vmatprep.subr.bf16.mxu1 %v4605_v0  ;;  %v4651_v47 = vcombine.high %v320_v41, %v324_v42  ;;  %v328_v49 = vld [vmem:[#allocation2 + $0x380] sm:$0xff]  ;;  %v4650_v55 = vcombine.low %v320_v41, %v324_v42  ;;  %v4661_v59 = vcombine.high %v329_v51, %v333_v52  ;;  %v337_v62 = vld [vmem:[#allocation2 + $0x3c8] sm:$0xff] }
  0x63   : > { %v332_v50 = vld [vmem:[#allocation2 + $0x3a0] sm:$0xff]  ;;  %v341_v63 = vld [vmem:[#allocation2 + $0x3e8] sm:$0xff]  ;;  %v4660_v1 = vcombine.low %v329_v51, %v333_v52 }
  0x64   : > { %v4659_v57 = vcombine.high %v328_v49, %v332_v50  ;;  %v336_v60 = vld [vmem:[#allocation2 + $0x3c0] sm:$0xff]  ;;  %v4658_v0 = vcombine.low %v328_v49, %v332_v50  ;;  %v4669_v3 = vcombine.high %v337_v62, %v341_v63  ;;  %v4668_v9 = vcombine.low %v337_v62, %v341_v63  ;;  %v5480_v17 = vld [vmem:[%s5461_s20 + $0x8] sm:$0xff] }
  0x65   : > { %3343 = vmatpush1.bf16.msra.mxu0 %v4602_v5  ;;  %3515 = vmatpush1.bf16.msra.mxu1 %v4604_v6  ;;  %v340_v61 = vld [vmem:[#allocation2 + $0x3e0] sm:$0xff]  ;;  %v345_v6 = vld [vmem:[#allocation2 + $0x408] sm:$0xff] }
  0x66   : > { %3344 = vmatprep.subr.bf16.mxu0 %v4611_v7  ;;  %3516 = vmatprep.subr.bf16.mxu1 %v4613_v8  ;;  %v4667_v2 = vcombine.high %v336_v60, %v340_v61  ;;  %v344_v4 = vld [vmem:[#allocation2 + $0x400] sm:$0xff]  ;;  %v349_v7 = vld [vmem:[#allocation2 + $0x428] sm:$0xff]  ;;  %v4666_v8 = vcombine.low %v336_v60, %v340_v61 }
  0x67   : > { %v348_v5 = vld [vmem:[#allocation2 + $0x420] sm:$0xff]  ;;  %v4677_v11 = vcombine.high %v345_v6, %v349_v7  ;;  %v5483_v18 = vld [vmem:[%s5461_s20 + $0x28] sm:$0xff]  ;;  %v4676_v20 = vcombine.low %v345_v6, %v349_v7 }
  0x68   : > { %v4675_v10 = vcombine.high %v344_v4, %v348_v5  ;;  %v352_v12 = vld [vmem:[#allocation2 + $0x440] sm:$0xff]  ;;  %v4674_v19 = vcombine.low %v344_v4, %v348_v5  ;;  %v361_v25 = vld [vmem:[#allocation2 + $0x488] sm:$0xff] }
  0x69   : > { %3345 = vmatpush1.bf16.msra.mxu0 %v4610_v13  ;;  %3517 = vmatpush1.bf16.msra.mxu1 %v4612_v14  ;;  %v356_v13 = vld [vmem:[#allocation2 + $0x460] sm:$0xff]  ;;  %v353_v14 = vld [vmem:[#allocation2 + $0x448] sm:$0xff] }
  0x6a   : > { %3346 = vmatprep.subr.bf16.mxu0 %v4619_v15  ;;  %3518 = vmatprep.subr.bf16.mxu1 %v4621_v16  ;;  %v5477_v15 = vcombine.low %v5464_v53, %v5467_v54  ;;  %v357_v16 = vld [vmem:[#allocation2 + $0x468] sm:$0xff]  ;;  %v5487_v53 = vcombine.high %v5480_v17, %v5483_v18  ;;  %v4682_v26 = vcombine.low %v352_v12, %v356_v13 }
  0x6b   : > { %v365_v54 = vld [vmem:[#allocation2 + $0x4a8] sm:$0xff]  ;;  %v4684_v27 = vcombine.low %v353_v14, %v357_v16 }
  0x6c   : > { %v373_v33 = vld [vmem:[#allocation2 + $0x4e8] sm:$0xff]  ;;  %v4692_v35 = vcombine.low %v361_v25, %v365_v54 }
  0x6d   : > { %3347 = vmatpush1.bf16.msra.mxu0 %v4618_v21  ;;  %3519 = vmatpush1.bf16.msra.mxu1 %v4620_v22  ;;  %v4683_v21 = vcombine.high %v352_v12, %v356_v13  ;;  %v4685_v22 = vcombine.high %v353_v14, %v357_v16  ;;  %v381_v41 = vld [vmem:[#allocation2 + $0x528] sm:$0xff] }
  0x6e   : > { %3348 = vmatprep.subr.bf16.mxu0 %v4627_v23  ;;  %3520 = vmatprep.subr.bf16.mxu1 %v4629_v24  ;;  %v360_v23 = vld [vmem:[#allocation2 + $0x480] sm:$0xff]  ;;  %v389_v49 = vld [vmem:[#allocation2 + $0x568] sm:$0xff] }
  0x6f   : > { %v364_v24 = vld [vmem:[#allocation2 + $0x4a0] sm:$0xff]  ;;  %v397_v60 = vld [vmem:[#allocation2 + $0x5a8] sm:$0xff] }
  0x70   : > { %v4691_v28 = vcombine.high %v360_v23, %v364_v24  ;;  %v4690_v34 = vcombine.low %v360_v23, %v364_v24  ;;  %v405_v4 = vld [vmem:[#allocation2 + $0x5e8] sm:$0xff] }
  0x71   : > { %3349 = vmatpush1.bf16.msra.mxu0 %v4626_v29  ;;  %3521 = vmatpush1.bf16.msra.mxu1 %v4628_v30  ;;  %v368_v29 = vld [vmem:[#allocation2 + $0x4c0] sm:$0xff]  ;;  %v413_v12 = vld [vmem:[#allocation2 + $0x628] sm:$0xff] }
  0x72   : > { %3350 = vmatprep.subr.bf16.mxu0 %v4635_v31  ;;  %3522 = vmatprep.subr.bf16.mxu1 %v4637_v32  ;;  %v372_v30 = vld [vmem:[#allocation2 + $0x4e0] sm:$0xff]  ;;  %v369_v31 = vld [vmem:[#allocation2 + $0x4c8] sm:$0xff]  ;;  %v4693_v32 = vcombine.high %v361_v25, %v365_v54 }
  0x73   : > { %v4699_v36 = vcombine.high %v368_v29, %v372_v30  ;;  %v4698_v42 = vcombine.low %v368_v29, %v372_v30  ;;  %v4700_v43 = vcombine.low %v369_v31, %v373_v33  ;;  %v421_v23 = vld [vmem:[#allocation2 + $0x668] sm:$0xff] }
  0x74   : > { %v425_v29 = vld [vmem:[#allocation2 + $0x688] sm:$0xff] }
  0x75   : > { %3351 = vmatpush1.bf16.msra.mxu0 %v4634_v37  ;;  %3523 = vmatpush1.bf16.msra.mxu1 %v4636_v38  ;;  %v376_v37 = vld [vmem:[#allocation2 + $0x500] sm:$0xff]  ;;  %v429_v30 = vld [vmem:[#allocation2 + $0x6a8] sm:$0xff] }
  0x76   : > { %3352 = vmatprep.subr.bf16.mxu0 %v4643_v39  ;;  %3524 = vmatprep.subr.bf16.mxu1 %v4645_v40  ;;  %v380_v38 = vld [vmem:[#allocation2 + $0x520] sm:$0xff]  ;;  %v377_v39 = vld [vmem:[#allocation2 + $0x508] sm:$0xff]  ;;  %v4701_v40 = vcombine.high %v369_v31, %v373_v33 }
  0x77   : > { %v4707_v44 = vcombine.high %v376_v37, %v380_v38  ;;  %v4706_v50 = vcombine.low %v376_v37, %v380_v38  ;;  %v4708_v51 = vcombine.low %v377_v39, %v381_v41  ;;  %v433_v37 = vld [vmem:[#allocation2 + $0x6c8] sm:$0xff] }
  0x78   : > { %v437_v38 = vld [vmem:[#allocation2 + $0x6e8] sm:$0xff] }
  0x79   : > { %3353 = vmatpush1.bf16.msra.mxu0 %v4642_v45  ;;  %3525 = vmatpush1.bf16.msra.mxu1 %v4644_v46  ;;  %v384_v45 = vld [vmem:[#allocation2 + $0x540] sm:$0xff] }
  0x7a   : > { %3354 = vmatprep.subr.bf16.mxu0 %v4651_v47  ;;  %3526 = vmatprep.subr.bf16.mxu1 %v4653_v48  ;;  %v388_v46 = vld [vmem:[#allocation2 + $0x560] sm:$0xff]  ;;  %v385_v47 = vld [vmem:[#allocation2 + $0x548] sm:$0xff]  ;;  %v4709_v48 = vcombine.high %v377_v39, %v381_v41 }
  0x7b   : > { %v4715_v52 = vcombine.high %v384_v45, %v388_v46  ;;  %v4714_v61 = vcombine.low %v384_v45, %v388_v46  ;;  %v4716_v62 = vcombine.low %v385_v47, %v389_v49  ;;  %v441_v45 = vld [vmem:[#allocation2 + $0x708] sm:$0xff] }
  0x7c   : > { %v445_v46 = vld [vmem:[#allocation2 + $0x728] sm:$0xff] }
  0x7d   : > { %3355 = vmatpush1.bf16.msra.mxu0 %v4650_v55  ;;  %3527 = vmatpush1.bf16.msra.mxu1 %v4652_v56  ;;  %v392_v55 = vld [vmem:[#allocation2 + $0x580] sm:$0xff] }
  0x7e   : > { %3356 = vmatprep.subr.bf16.mxu0 %v4659_v57  ;;  %3528 = vmatprep.subr.bf16.mxu1 %v4661_v59  ;;  %v396_v56 = vld [vmem:[#allocation2 + $0x5a0] sm:$0xff]  ;;  %v393_v57 = vld [vmem:[#allocation2 + $0x588] sm:$0xff]  ;;  %v4717_v59 = vcombine.high %v385_v47, %v389_v49 }
  0x7f   : > { %v4723_v63 = vcombine.high %v392_v55, %v396_v56  ;;  %v4722_v5 = vcombine.low %v392_v55, %v396_v56  ;;  %v4724_v6 = vcombine.low %v393_v57, %v397_v60  ;;  %v449_v55 = vld [vmem:[#allocation2 + $0x748] sm:$0xff] }
  0x80   : > { %v453_v56 = vld [vmem:[#allocation2 + $0x768] sm:$0xff] }
  0x81   : > { %3357 = vmatpush1.bf16.msra.mxu0 %v4658_v0  ;;  %3529 = vmatpush1.bf16.msra.mxu1 %v4660_v1  ;;  %v400_v0 = vld [vmem:[#allocation2 + $0x5c0] sm:$0xff] }
  0x82   : > { %3358 = vmatprep.subr.bf16.mxu0 %v4667_v2  ;;  %3530 = vmatprep.subr.bf16.mxu1 %v4669_v3  ;;  %v404_v1 = vld [vmem:[#allocation2 + $0x5e0] sm:$0xff]  ;;  %v401_v2 = vld [vmem:[#allocation2 + $0x5c8] sm:$0xff]  ;;  %v4725_v3 = vcombine.high %v393_v57, %v397_v60 }
  0x83   : > { %v4731_v7 = vcombine.high %v400_v0, %v404_v1  ;;  %v4730_v13 = vcombine.low %v400_v0, %v404_v1  ;;  %v4732_v14 = vcombine.low %v401_v2, %v405_v4  ;;  %v457_v0 = vld [vmem:[#allocation2 + $0x788] sm:$0xff] }
  0x84   : > { %v461_v1 = vld [vmem:[#allocation2 + $0x7a8] sm:$0xff] }
  0x85   : > { %3359 = vmatpush1.bf16.msra.mxu0 %v4666_v8  ;;  %3531 = vmatpush1.bf16.msra.mxu1 %v4668_v9  ;;  %v408_v8 = vld [vmem:[#allocation2 + $0x600] sm:$0xff] }
  0x86   : > { %3371 = vmatprep.subr.bf16.mxu0 %v4675_v10  ;;  %3543 = vmatprep.subr.bf16.mxu1 %v4677_v11  ;;  %v412_v9 = vld [vmem:[#allocation2 + $0x620] sm:$0xff]  ;;  %v409_v10 = vld [vmem:[#allocation2 + $0x608] sm:$0xff]  ;;  %v4733_v11 = vcombine.high %v401_v2, %v405_v4 }
  0x87   : > { %v4739_v16 = vcombine.high %v408_v8, %v412_v9  ;;  %v4738_v24 = vcombine.low %v408_v8, %v412_v9  ;;  %v4740_v25 = vcombine.low %v409_v10, %v413_v12  ;;  %v465_v8 = vld [vmem:[#allocation2 + $0x7c8] sm:$0xff] }
  0x88   : > { %3361 = vmatmul.mubr.bf16.vlgmr.msra.gmra.mrb[0].mxu0 %v5477_v15  ;;  %3533 = vmatmul.mubr.bf16.vlgmr.msra.gmra.mrb[0].mxu1 %v5477_v15  ;;  %v469_v9 = vld [vmem:[#allocation2 + $0x7e8] sm:$0xff] }
  0x89   : > { %3372 = vmatpush1.bf16.msra.mxu0 %v4674_v19  ;;  %3544 = vmatpush1.bf16.msra.mxu1 %v4676_v20  ;;  %v416_v19 = vld [vmem:[#allocation2 + $0x640] sm:$0xff] }
  0x8a   : > { %3373 = vmatprep.subr.bf16.mxu0 %v4683_v21  ;;  %3545 = vmatprep.subr.bf16.mxu1 %v4685_v22  ;;  %v420_v20 = vld [vmem:[#allocation2 + $0x660] sm:$0xff]  ;;  %v417_v21 = vld [vmem:[#allocation2 + $0x648] sm:$0xff]  ;;  %v4741_v22 = vcombine.high %v409_v10, %v413_v12 }
  0x8b   : > { %3403 = vmatprep.mubr.bf16.mxu0 %v5487_v53  ;;  %3575 = vmatprep.mubr.bf16.mxu1 %v5487_v53  ;;  %v4747_v54 = vcombine.high %v416_v19, %v420_v20  ;;  %v4746_v31 = vcombine.low %v416_v19, %v420_v20  ;;  %v473_v19 = vld [vmem:[#allocation2 + $0x808] sm:$0xff] }
  0x8c   : > { %v477_v20 = vld [vmem:[#allocation2 + $0x828] sm:$0xff] }
  0x8d   : > { %3374 = vmatpush1.bf16.msra.mxu0 %v4682_v26  ;;  %3546 = vmatpush1.bf16.msra.mxu1 %v4684_v27  ;;  %v424_v26 = vld [vmem:[#allocation2 + $0x680] sm:$0xff]  ;;  %v4749_v27 = vcombine.high %v417_v21, %v421_v23 }
  0x8e   : > { %3375 = vmatprep.subr.bf16.mxu0 %v4691_v28  ;;  %3547 = vmatprep.subr.bf16.mxu1 %v4693_v32  ;;  %v428_v28 = vld [vmem:[#allocation2 + $0x6a0] sm:$0xff]  ;;  %v4748_v32 = vcombine.low %v417_v21, %v421_v23 }
  0x8f   : > { %v4755_v33 = vcombine.high %v424_v26, %v428_v28  ;;  %v4754_v39 = vcombine.low %v424_v26, %v428_v28  ;;  %v481_v26 = vld [vmem:[#allocation2 + $0x848] sm:$0xff] }
  0x90   : > { %v485_v28 = vld [vmem:[#allocation2 + $0x868] sm:$0xff] }
  0x91   : > { %3376 = vmatpush1.bf16.msra.mxu0 %v4690_v34  ;;  %3548 = vmatpush1.bf16.msra.mxu1 %v4692_v35  ;;  %v4757_v34 = vcombine.high %v425_v29, %v429_v30  ;;  %v432_v35 = vld [vmem:[#allocation2 + $0x6c0] sm:$0xff] }
  0x92   : > { %3377 = vmatprep.subr.bf16.mxu0 %v4699_v36  ;;  %3549 = vmatprep.subr.bf16.mxu1 %v4701_v40  ;;  %v436_v36 = vld [vmem:[#allocation2 + $0x6e0] sm:$0xff]  ;;  %v4756_v40 = vcombine.low %v425_v29, %v429_v30  ;;  %v5498_v29 = vld [vmem:[%s5461_s20 + $0x10] sm:$0xff] }
  0x93   : > { %v4763_v41 = vcombine.high %v432_v35, %v436_v36  ;;  %v4762_v47 = vcombine.low %v432_v35, %v436_v36  ;;  %v5501_v30 = vld [vmem:[%s5461_s20 + $0x30] sm:$0xff]  ;;  %v488_v35 = vld [vmem:[#allocation2 + $0x880] sm:$0xff] }
  0x94   : > { %v492_v36 = vld [vmem:[#allocation2 + $0x8a0] sm:$0xff] }
  0x95   : > { %3378 = vmatpush1.bf16.msra.mxu0 %v4698_v42  ;;  %3550 = vmatpush1.bf16.msra.mxu1 %v4700_v43  ;;  %v4765_v42 = vcombine.high %v433_v37, %v437_v38  ;;  %v440_v43 = vld [vmem:[#allocation2 + $0x700] sm:$0xff] }
  0x96   : > { %3379 = vmatprep.subr.bf16.mxu0 %v4707_v44  ;;  %3551 = vmatprep.subr.bf16.mxu1 %v4709_v48  ;;  %v444_v44 = vld [vmem:[#allocation2 + $0x720] sm:$0xff]  ;;  %v4764_v48 = vcombine.low %v433_v37, %v437_v38  ;;  %v5505_v37 = vcombine.high %v5498_v29, %v5501_v30 }
  0x97   : > { %v4771_v49 = vcombine.high %v440_v43, %v444_v44  ;;  %v4770_v57 = vcombine.low %v440_v43, %v444_v44  ;;  %v500_v43 = vld [vmem:[#allocation2 + $0x8e0] sm:$0xff]  ;;  %v497_v44 = vld [vmem:[#allocation2 + $0x8c8] sm:$0xff] }
  0x99   : > { %3380 = vmatpush1.bf16.msra.mxu0 %v4706_v50  ;;  %3552 = vmatpush1.bf16.msra.mxu1 %v4708_v51  ;;  %v4773_v50 = vcombine.high %v441_v45, %v445_v46  ;;  %v448_v51 = vld [vmem:[#allocation2 + $0x740] sm:$0xff] }
  0x9a   : > { %3381 = vmatprep.subr.bf16.mxu0 %v4715_v52  ;;  %3553 = vmatprep.subr.bf16.mxu1 %v4717_v59  ;;  %v452_v52 = vld [vmem:[#allocation2 + $0x760] sm:$0xff]  ;;  %v4772_v59 = vcombine.low %v441_v45, %v445_v46  ;;  %v501_v45 = vld [vmem:[#allocation2 + $0x8e8] sm:$0xff]  ;;  %v4818_v46 = vcombine.low %v488_v35, %v492_v36 }
  0x9b   : > { %v4779_v60 = vcombine.high %v448_v51, %v452_v52  ;;  %v4778_v2 = vcombine.low %v448_v51, %v452_v52  ;;  %v508_v51 = vld [vmem:[#allocation2 + $0x920] sm:$0xff]  ;;  %v505_v52 = vld [vmem:[#allocation2 + $0x908] sm:$0xff] }
  0x9d   : > { %3382 = vmatpush1.bf16.msra.mxu0 %v4714_v61  ;;  %3554 = vmatpush1.bf16.msra.mxu1 %v4716_v62  ;;  %v4781_v61 = vcombine.high %v449_v55, %v453_v56  ;;  %v456_v62 = vld [vmem:[#allocation2 + $0x780] sm:$0xff] }
  0x9e   : > { %3383 = vmatprep.subr.bf16.mxu0 %v4723_v63  ;;  %3555 = vmatprep.subr.bf16.mxu1 %v4725_v3  ;;  %v460_v63 = vld [vmem:[#allocation2 + $0x7a0] sm:$0xff]  ;;  %v4780_v3 = vcombine.low %v449_v55, %v453_v56  ;;  %v509_v55 = vld [vmem:[#allocation2 + $0x928] sm:$0xff] }
  0x9f   : > { %v4787_v4 = vcombine.high %v456_v62, %v460_v63  ;;  %v4786_v10 = vcombine.low %v456_v62, %v460_v63  ;;  %v516_v62 = vld [vmem:[#allocation2 + $0x960] sm:$0xff]  ;;  %v513_v63 = vld [vmem:[#allocation2 + $0x948] sm:$0xff] }
  0xa1   : > { %3384 = vmatpush1.bf16.msra.mxu0 %v4722_v5  ;;  %3556 = vmatpush1.bf16.msra.mxu1 %v4724_v6  ;;  %v4789_v5 = vcombine.high %v457_v0, %v461_v1  ;;  %v464_v6 = vld [vmem:[#allocation2 + $0x7c0] sm:$0xff] }
  0xa2   : > { %3385 = vmatprep.subr.bf16.mxu0 %v4731_v7  ;;  %3557 = vmatprep.subr.bf16.mxu1 %v4733_v11  ;;  %v468_v7 = vld [vmem:[#allocation2 + $0x7e0] sm:$0xff]  ;;  %v4788_v11 = vcombine.low %v457_v0, %v461_v1  ;;  %v517_v0 = vld [vmem:[#allocation2 + $0x968] sm:$0xff] }
  0xa3   : > { %v4795_v12 = vcombine.high %v464_v6, %v468_v7  ;;  %v4794_v21 = vcombine.low %v464_v6, %v468_v7  ;;  %v524_v6 = vld [vmem:[#allocation2 + $0x9a0] sm:$0xff]  ;;  %v521_v7 = vld [vmem:[#allocation2 + $0x988] sm:$0xff] }
  0xa5   : > { %3386 = vmatpush1.bf16.msra.mxu0 %v4730_v13  ;;  %3558 = vmatpush1.bf16.msra.mxu1 %v4732_v14  ;;  %v4797_v13 = vcombine.high %v465_v8, %v469_v9  ;;  %v472_v14 = vld [vmem:[#allocation2 + $0x800] sm:$0xff] }
  0xa6   : > { %3387 = vmatprep.subr.bf16.mxu0 %v4739_v16  ;;  %3559 = vmatprep.subr.bf16.mxu1 %v4741_v22  ;;  %v476_v16 = vld [vmem:[#allocation2 + $0x820] sm:$0xff]  ;;  %v4796_v22 = vcombine.low %v465_v8, %v469_v9  ;;  %v525_v8 = vld [vmem:[#allocation2 + $0x9a8] sm:$0xff] }
  0xa7   : > { %v4803_v23 = vcombine.high %v472_v14, %v476_v16 }
  0xa9   : > { %3388 = vmatpush1.bf16.msra.mxu0 %v4738_v24  ;;  %3560 = vmatpush1.bf16.msra.mxu1 %v4740_v25  ;;  %v4805_v24 = vcombine.high %v473_v19, %v477_v20  ;;  %v480_v25 = vld [vmem:[#allocation2 + $0x840] sm:$0xff] }
  0xaa   : > { %3389 = vmatprep.subr.bf16.mxu0 %v4747_v54  ;;  %3561 = vmatprep.subr.bf16.mxu1 %v4749_v27  ;;  %v484_v54 = vld [vmem:[#allocation2 + $0x860] sm:$0xff]  ;;  %v5495_v27 = vcombine.low %v5480_v17, %v5483_v18  ;;  %v489_v17 = vld [vmem:[#allocation2 + $0x888] sm:$0xff] }
  0xab   : > { %v493_v18 = vld [vmem:[#allocation2 + $0x8a8] sm:$0xff]  ;;  %v4810_v38 = vcombine.low %v480_v25, %v484_v54 }
  0xad   : > { %3390 = vmatpush1.bf16.msra.mxu0 %v4746_v31  ;;  %3562 = vmatpush1.bf16.msra.mxu1 %v4748_v32  ;;  %v4802_v31 = vcombine.low %v472_v14, %v476_v16  ;;  %v4804_v32 = vcombine.low %v473_v19, %v477_v20  ;;  %v532_v14 = vld [vmem:[#allocation2 + $0x9e0] sm:$0xff]  ;;  %v529_v16 = vld [vmem:[#allocation2 + $0x9c8] sm:$0xff] }
  0xae   : > { %3391 = vmatprep.subr.bf16.mxu0 %v4755_v33  ;;  %3563 = vmatprep.subr.bf16.mxu1 %v4757_v34  ;;  %v4811_v33 = vcombine.high %v480_v25, %v484_v54  ;;  %v4813_v34 = vcombine.high %v481_v26, %v485_v28  ;;  %v533_v19 = vld [vmem:[#allocation2 + $0x9e8] sm:$0xff]  ;;  %v540_v25 = vld [vmem:[#allocation2 + $0xa20] sm:$0xff] }
  0xaf   : > { %v537_v54 = vld [vmem:[#allocation2 + $0xa08] sm:$0xff] }
  0xb1   : > { %3392 = vmatpush1.bf16.msra.mxu0 %v4754_v39  ;;  %3564 = vmatpush1.bf16.msra.mxu1 %v4756_v40  ;;  %v4812_v39 = vcombine.low %v481_v26, %v485_v28  ;;  %v4819_v40 = vcombine.high %v488_v35, %v492_v36  ;;  %v541_v26 = vld [vmem:[#allocation2 + $0xa28] sm:$0xff]  ;;  %v548_v35 = vld [vmem:[#allocation2 + $0xa60] sm:$0xff] }
  0xb2   : > { %3393 = vmatprep.subr.bf16.mxu0 %v4763_v41  ;;  %3565 = vmatprep.subr.bf16.mxu1 %v4765_v42  ;;  %v4821_v41 = vcombine.high %v489_v17, %v493_v18  ;;  %v496_v42 = vld [vmem:[#allocation2 + $0x8c0] sm:$0xff]  ;;  %v545_v36 = vld [vmem:[#allocation2 + $0xa48] sm:$0xff] }
  0xb3   : > { %v4826_v56 = vcombine.low %v496_v42, %v500_v43 }
  0xb5   : > { %3394 = vmatpush1.bf16.msra.mxu0 %v4762_v47  ;;  %3566 = vmatpush1.bf16.msra.mxu1 %v4764_v48  ;;  %v4820_v47 = vcombine.low %v489_v17, %v493_v18  ;;  %v4827_v48 = vcombine.high %v496_v42, %v500_v43  ;;  %v549_v17 = vld [vmem:[#allocation2 + $0xa68] sm:$0xff]  ;;  %v556_v42 = vld [vmem:[#allocation2 + $0xaa0] sm:$0xff] }
  0xb6   : > { %3395 = vmatprep.subr.bf16.mxu0 %v4771_v49  ;;  %3567 = vmatprep.subr.bf16.mxu1 %v4773_v50  ;;  %v4829_v49 = vcombine.high %v497_v44, %v501_v45  ;;  %v504_v50 = vld [vmem:[#allocation2 + $0x900] sm:$0xff]  ;;  %v553_v43 = vld [vmem:[#allocation2 + $0xa88] sm:$0xff] }
  0xb7   : > { %v4834_v1 = vcombine.low %v504_v50, %v508_v51 }
  0xb9   : > { %3396 = vmatpush1.bf16.msra.mxu0 %v4770_v57  ;;  %3568 = vmatpush1.bf16.msra.mxu1 %v4772_v59  ;;  %v4828_v57 = vcombine.low %v497_v44, %v501_v45  ;;  %v4835_v59 = vcombine.high %v504_v50, %v508_v51  ;;  %v557_v44 = vld [vmem:[#allocation2 + $0xaa8] sm:$0xff]  ;;  %v564_v50 = vld [vmem:[#allocation2 + $0xae0] sm:$0xff] }
  0xba   : > { %3397 = vmatprep.subr.bf16.mxu0 %v4779_v60  ;;  %3569 = vmatprep.subr.bf16.mxu1 %v4781_v61  ;;  %v4837_v60 = vcombine.high %v505_v52, %v509_v55  ;;  %v512_v61 = vld [vmem:[#allocation2 + $0x940] sm:$0xff]  ;;  %v561_v51 = vld [vmem:[#allocation2 + $0xac8] sm:$0xff] }
  0xbb   : > { %v4842_v9 = vcombine.low %v512_v61, %v516_v62 }
  0xbd   : > { %3398 = vmatpush1.bf16.msra.mxu0 %v4778_v2  ;;  %3570 = vmatpush1.bf16.msra.mxu1 %v4780_v3  ;;  %v4836_v2 = vcombine.low %v505_v52, %v509_v55  ;;  %v4843_v3 = vcombine.high %v512_v61, %v516_v62  ;;  %v565_v52 = vld [vmem:[#allocation2 + $0xae8] sm:$0xff]  ;;  %v572_v61 = vld [vmem:[#allocation2 + $0xb20] sm:$0xff] }
  0xbe   : > { %3399 = vmatprep.subr.bf16.mxu0 %v4787_v4  ;;  %3571 = vmatprep.subr.bf16.mxu1 %v4789_v5  ;;  %v4845_v4 = vcombine.high %v513_v63, %v517_v0  ;;  %v520_v5 = vld [vmem:[#allocation2 + $0x980] sm:$0xff]  ;;  %v569_v62 = vld [vmem:[#allocation2 + $0xb08] sm:$0xff] }
  0xbf   : > { %v4850_v20 = vcombine.low %v520_v5, %v524_v6 }
  0xc1   : > { %3400 = vmatpush1.bf16.msra.mxu0 %v4786_v10  ;;  %3572 = vmatpush1.bf16.msra.mxu1 %v4788_v11  ;;  %v4844_v10 = vcombine.low %v513_v63, %v517_v0  ;;  %v4851_v11 = vcombine.high %v520_v5, %v524_v6  ;;  %v573_v63 = vld [vmem:[#allocation2 + $0xb28] sm:$0xff]  ;;  %v580_v5 = vld [vmem:[#allocation2 + $0xb60] sm:$0xff] }
  0xc2   : > { %3401 = vmatprep.subr.bf16.mxu0 %v4795_v12  ;;  %3573 = vmatprep.subr.bf16.mxu1 %v4797_v13  ;;  %v4853_v12 = vcombine.high %v521_v7, %v525_v8  ;;  %v528_v13 = vld [vmem:[#allocation2 + $0x9c0] sm:$0xff]  ;;  %v577_v6 = vld [vmem:[#allocation2 + $0xb48] sm:$0xff] }
  0xc3   : > { %v4858_v28 = vcombine.low %v528_v13, %v532_v14 }
  0xc5   : > { %3402 = vmatpush1.bf16.msra.mxu0 %v4794_v21  ;;  %3574 = vmatpush1.bf16.msra.mxu1 %v4796_v22  ;;  %v4852_v21 = vcombine.low %v521_v7, %v525_v8  ;;  %v4859_v22 = vcombine.high %v528_v13, %v532_v14  ;;  %v581_v7 = vld [vmem:[#allocation2 + $0xb68] sm:$0xff]  ;;  %v588_v13 = vld [vmem:[#allocation2 + $0xba0] sm:$0xff] }
  0xc6   : > { %3414 = vmatprep.subr.bf16.mxu0 %v4803_v23  ;;  %3586 = vmatprep.subr.bf16.mxu1 %v4805_v24  ;;  %v4861_v23 = vcombine.high %v529_v16, %v533_v19  ;;  %v536_v24 = vld [vmem:[#allocation2 + $0xa00] sm:$0xff]  ;;  %v585_v14 = vld [vmem:[#allocation2 + $0xb88] sm:$0xff] }
  0xc7   : > { %v4866_v18 = vcombine.low %v536_v24, %v540_v25 }
  0xc8   : > { %3404 = vmatmul.mubr.bf16.vlgmr.msra.gmra.mrb[0].mxu0 %v5495_v27  ;;  %3576 = vmatmul.mubr.bf16.vlgmr.msra.gmra.mrb[0].mxu1 %v5495_v27 }
  0xc9   : > { %3415 = vmatpush1.bf16.msra.mxu0 %v4802_v31  ;;  %3587 = vmatpush1.bf16.msra.mxu1 %v4804_v32  ;;  %v4860_v31 = vcombine.low %v529_v16, %v533_v19  ;;  %v4867_v32 = vcombine.high %v536_v24, %v540_v25  ;;  %v589_v16 = vld [vmem:[#allocation2 + $0xba8] sm:$0xff]  ;;  %v596_v24 = vld [vmem:[#allocation2 + $0xbe0] sm:$0xff] }
  0xca   : > { %3416 = vmatprep.subr.bf16.mxu0 %v4811_v33  ;;  %3588 = vmatprep.subr.bf16.mxu1 %v4813_v34  ;;  %v4869_v33 = vcombine.high %v537_v54, %v541_v26  ;;  %v544_v34 = vld [vmem:[#allocation2 + $0xa40] sm:$0xff]  ;;  %v593_v25 = vld [vmem:[#allocation2 + $0xbc8] sm:$0xff] }
  0xcb   : > { %3446 = vmatprep.mubr.bf16.mxu0 %v5505_v37  ;;  %3618 = vmatprep.mubr.bf16.mxu1 %v5505_v37  ;;  %v4874_v45 = vcombine.low %v544_v34, %v548_v35 }
  0xcd   : > { %3417 = vmatpush1.bf16.msra.mxu0 %v4810_v38  ;;  %3589 = vmatpush1.bf16.msra.mxu1 %v4812_v39  ;;  %v4868_v38 = vcombine.low %v537_v54, %v541_v26  ;;  %v4875_v39 = vcombine.high %v544_v34, %v548_v35  ;;  %v597_v54 = vld [vmem:[#allocation2 + $0xbe8] sm:$0xff]  ;;  %v604_v34 = vld [vmem:[#allocation2 + $0xc20] sm:$0xff] }
  0xce   : > { %3418 = vmatprep.subr.bf16.mxu0 %v4819_v40  ;;  %3590 = vmatprep.subr.bf16.mxu1 %v4821_v41  ;;  %v4877_v40 = vcombine.high %v545_v36, %v549_v17  ;;  %v552_v41 = vld [vmem:[#allocation2 + $0xa80] sm:$0xff]  ;;  %v601_v35 = vld [vmem:[#allocation2 + $0xc08] sm:$0xff] }
  0xcf   : > { %v4882_v55 = vcombine.low %v552_v41, %v556_v42 }
  0xd1   : > { %3419 = vmatpush1.bf16.msra.mxu0 %v4818_v46  ;;  %3591 = vmatpush1.bf16.msra.mxu1 %v4820_v47  ;;  %v4876_v46 = vcombine.low %v545_v36, %v549_v17  ;;  %v4883_v47 = vcombine.high %v552_v41, %v556_v42  ;;  %v605_v36 = vld [vmem:[#allocation2 + $0xc28] sm:$0xff]  ;;  %v612_v41 = vld [vmem:[#allocation2 + $0xc60] sm:$0xff] }
  0xd2   : > { %3420 = vmatprep.subr.bf16.mxu0 %v4827_v48  ;;  %3592 = vmatprep.subr.bf16.mxu1 %v4829_v49  ;;  %v4885_v48 = vcombine.high %v553_v43, %v557_v44  ;;  %v560_v49 = vld [vmem:[#allocation2 + $0xac0] sm:$0xff]  ;;  %v609_v42 = vld [vmem:[#allocation2 + $0xc48] sm:$0xff] }
  0xd3   : > { %v4890_v0 = vcombine.low %v560_v49, %v564_v50 }
  0xd5   : > { %3421 = vmatpush1.bf16.msra.mxu0 %v4826_v56  ;;  %3593 = vmatpush1.bf16.msra.mxu1 %v4828_v57  ;;  %v4884_v56 = vcombine.low %v553_v43, %v557_v44  ;;  %v4891_v57 = vcombine.high %v560_v49, %v564_v50  ;;  %v5513_v43 = vcombine.low %v5498_v29, %v5501_v30  ;;  %v613_v44 = vld [vmem:[#allocation2 + $0xc68] sm:$0xff] }
  0xd6   : > { %3422 = vmatprep.subr.bf16.mxu0 %v4835_v59  ;;  %3594 = vmatprep.subr.bf16.mxu1 %v4837_v60  ;;  %v4893_v59 = vcombine.high %v561_v51, %v565_v52  ;;  %v568_v60 = vld [vmem:[#allocation2 + $0xb00] sm:$0xff]  ;;  %v4941_v50 = vcombine.high %v609_v42, %v613_v44  ;;  %v617_v29 = vld [vmem:[#allocation2 + $0xc88] sm:$0xff] }
  0xd7   : > { %v4898_v8 = vcombine.low %v568_v60, %v572_v61  ;;  %v621_v30 = vld [vmem:[#allocation2 + $0xca8] sm:$0xff] }
  0xd9   : > { %3423 = vmatpush1.bf16.msra.mxu0 %v4834_v1  ;;  %3595 = vmatpush1.bf16.msra.mxu1 %v4836_v2  ;;  %v4892_v1 = vcombine.low %v561_v51, %v565_v52  ;;  %v4899_v2 = vcombine.high %v568_v60, %v572_v61  ;;  %v616_v51 = vld [vmem:[#allocation2 + $0xc80] sm:$0xff]  ;;  %v4949_v60 = vcombine.high %v617_v29, %v621_v30 }
  0xda   : > { %3424 = vmatprep.subr.bf16.mxu0 %v4843_v3  ;;  %3596 = vmatprep.subr.bf16.mxu1 %v4845_v4  ;;  %v4901_v3 = vcombine.high %v569_v62, %v573_v63  ;;  %v576_v4 = vld [vmem:[#allocation2 + $0xb40] sm:$0xff] }
  0xdb   : > { %v4906_v19 = vcombine.low %v576_v4, %v580_v5  ;;  %v620_v52 = vld [vmem:[#allocation2 + $0xca0] sm:$0xff] }
  0xdc   : > { %v624_v61 = vld [vmem:[#allocation2 + $0xcc0] sm:$0xff] }
  0xdd   : > { %3425 = vmatpush1.bf16.msra.mxu0 %v4842_v9  ;;  %3597 = vmatpush1.bf16.msra.mxu1 %v4844_v10  ;;  %v4900_v9 = vcombine.low %v569_v62, %v573_v63  ;;  %v4907_v10 = vcombine.high %v576_v4, %v580_v5  ;;  %v628_v62 = vld [vmem:[#allocation2 + $0xce0] sm:$0xff]  ;;  %v625_v63 = vld [vmem:[#allocation2 + $0xcc8] sm:$0xff] }
  0xde   : > { %3426 = vmatprep.subr.bf16.mxu0 %v4851_v11  ;;  %3598 = vmatprep.subr.bf16.mxu1 %v4853_v12  ;;  %v4909_v11 = vcombine.high %v577_v6, %v581_v7  ;;  %v584_v12 = vld [vmem:[#allocation2 + $0xb80] sm:$0xff] }
  0xdf   : > { %v4914_v26 = vcombine.low %v584_v12, %v588_v13  ;;  %v632_v5 = vld [vmem:[#allocation2 + $0xd00] sm:$0xff] }
  0xe1   : > { %3427 = vmatpush1.bf16.msra.mxu0 %v4850_v20  ;;  %3599 = vmatpush1.bf16.msra.mxu1 %v4852_v21  ;;  %v4908_v20 = vcombine.low %v577_v6, %v581_v7  ;;  %v4915_v21 = vcombine.high %v584_v12, %v588_v13  ;;  %v636_v6 = vld [vmem:[#allocation2 + $0xd20] sm:$0xff]  ;;  %v633_v7 = vld [vmem:[#allocation2 + $0xd08] sm:$0xff] }
  0xe2   : > { %3428 = vmatprep.subr.bf16.mxu0 %v4859_v22  ;;  %3600 = vmatprep.subr.bf16.mxu1 %v4861_v23  ;;  %v4917_v22 = vcombine.high %v585_v14, %v589_v16  ;;  %v592_v23 = vld [vmem:[#allocation2 + $0xbc0] sm:$0xff] }
  0xe3   : > { %v4922_v17 = vcombine.low %v592_v23, %v596_v24  ;;  %v640_v13 = vld [vmem:[#allocation2 + $0xd40] sm:$0xff] }
  0xe5   : > { %3429 = vmatpush1.bf16.msra.mxu0 %v4858_v28  ;;  %3601 = vmatpush1.bf16.msra.mxu1 %v4860_v31  ;;  %v4916_v28 = vcombine.low %v585_v14, %v589_v16  ;;  %v4923_v31 = vcombine.high %v592_v23, %v596_v24  ;;  %v644_v14 = vld [vmem:[#allocation2 + $0xd60] sm:$0xff]  ;;  %v641_v16 = vld [vmem:[#allocation2 + $0xd48] sm:$0xff] }
  0xe6   : > { %3430 = vmatprep.subr.bf16.mxu0 %v4867_v32  ;;  %3602 = vmatprep.subr.bf16.mxu1 %v4869_v33  ;;  %v4925_v32 = vcombine.high %v593_v25, %v597_v54  ;;  %v600_v33 = vld [vmem:[#allocation2 + $0xc00] sm:$0xff] }
  0xe7   : > { %v648_v24 = vld [vmem:[#allocation2 + $0xd80] sm:$0xff] }
  0xe9   : > { %3431 = vmatpush1.bf16.msra.mxu0 %v4866_v18  ;;  %3603 = vmatpush1.bf16.msra.mxu1 %v4868_v38  ;;  %v4924_v18 = vcombine.low %v593_v25, %v597_v54  ;;  %v4931_v38 = vcombine.high %v600_v33, %v604_v34  ;;  %v652_v25 = vld [vmem:[#allocation2 + $0xda0] sm:$0xff]  ;;  %v649_v54 = vld [vmem:[#allocation2 + $0xd88] sm:$0xff] }
  0xea   : > { %3432 = vmatprep.subr.bf16.mxu0 %v4875_v39  ;;  %3604 = vmatprep.subr.bf16.mxu1 %v4877_v40  ;;  %v4933_v39 = vcombine.high %v601_v35, %v605_v36  ;;  %v608_v40 = vld [vmem:[#allocation2 + $0xc40] sm:$0xff] }
  0xeb   : > { %v4939_v49 = vcombine.high %v608_v40, %v612_v41 }
  0xed   : > { %3433 = vmatpush1.bf16.msra.mxu0 %v4874_v45  ;;  %3605 = vmatpush1.bf16.msra.mxu1 %v4876_v46  ;;  %v5516_v45 = vld [vmem:[%s5461_s20 + $0x18] sm:$0xff] }
  0xee   : > { %3434 = vmatprep.subr.bf16.mxu0 %v4883_v47  ;;  %3606 = vmatprep.subr.bf16.mxu1 %v4885_v48  ;;  %v5519_v46 = vld [vmem:[%s5461_s20 + $0x38] sm:$0xff]  ;;  %v4930_v47 = vcombine.low %v600_v33, %v604_v34  ;;  %v4932_v48 = vcombine.low %v601_v35, %v605_v36  ;;  %v656_v34 = vld [vmem:[#allocation2 + $0xdc0] sm:$0xff]  ;;  %v657_v36 = vld [vmem:[#allocation2 + $0xdc8] sm:$0xff] }
  0xef   : > { %v660_v35 = vld [vmem:[#allocation2 + $0xde0] sm:$0xff] }
  0xf1   : > { %3435 = vmatpush1.bf16.msra.mxu0 %v4882_v55  ;;  %3607 = vmatpush1.bf16.msra.mxu1 %v4884_v56  ;;  %v5523_v55 = vcombine.high %v5516_v45, %v5519_v46  ;;  %v4938_v56 = vcombine.low %v608_v40, %v612_v41  ;;  %v664_v41 = vld [vmem:[#allocation2 + $0xe00] sm:$0xff] }
  0xf2   : > { %3436 = vmatprep.subr.bf16.mxu0 %v4891_v57  ;;  %3608 = vmatprep.subr.bf16.mxu1 %v4893_v59  ;;  %v4940_v57 = vcombine.low %v609_v42, %v613_v44  ;;  %v4947_v59 = vcombine.high %v616_v51, %v620_v52  ;;  %v668_v42 = vld [vmem:[#allocation2 + $0xe20] sm:$0xff]  ;;  %v665_v44 = vld [vmem:[#allocation2 + $0xe08] sm:$0xff] }
  0xf5   : > { %3437 = vmatpush1.bf16.msra.mxu0 %v4890_v0  ;;  %3609 = vmatpush1.bf16.msra.mxu1 %v4892_v1  ;;  %v629_v0 = vld [vmem:[#allocation2 + $0xce8] sm:$0xff]  ;;  %v4946_v1 = vcombine.low %v616_v51, %v620_v52  ;;  %v672_v52 = vld [vmem:[#allocation2 + $0xe40] sm:$0xff] }
  0xf6   : > { %3438 = vmatprep.subr.bf16.mxu0 %v4899_v2  ;;  %3610 = vmatprep.subr.bf16.mxu1 %v4901_v3  ;;  %v4948_v2 = vcombine.low %v617_v29, %v621_v30  ;;  %v4955_v3 = vcombine.high %v624_v61, %v628_v62  ;;  %v4957_v4 = vcombine.high %v625_v63, %v629_v0  ;;  %v676_v29 = vld [vmem:[#allocation2 + $0xe60] sm:$0xff]  ;;  %v673_v30 = vld [vmem:[#allocation2 + $0xe48] sm:$0xff] }
  0xf9   : > { %3439 = vmatpush1.bf16.msra.mxu0 %v4898_v8  ;;  %3611 = vmatpush1.bf16.msra.mxu1 %v4900_v9  ;;  %v637_v8 = vld [vmem:[#allocation2 + $0xd28] sm:$0xff]  ;;  %v4954_v9 = vcombine.low %v624_v61, %v628_v62  ;;  %v680_v62 = vld [vmem:[#allocation2 + $0xe80] sm:$0xff] }
  0xfa   : > { %3440 = vmatprep.subr.bf16.mxu0 %v4907_v10  ;;  %3612 = vmatprep.subr.bf16.mxu1 %v4909_v11  ;;  %v4956_v10 = vcombine.low %v625_v63, %v629_v0  ;;  %v4963_v11 = vcombine.high %v632_v5, %v636_v6  ;;  %v4965_v12 = vcombine.high %v633_v7, %v637_v8  ;;  %v684_v63 = vld [vmem:[#allocation2 + $0xea0] sm:$0xff]  ;;  %v681_v0 = vld [vmem:[#allocation2 + $0xe88] sm:$0xff] }
  0xfd   : > { %3441 = vmatpush1.bf16.msra.mxu0 %v4906_v19  ;;  %3613 = vmatpush1.bf16.msra.mxu1 %v4908_v20  ;;  %v645_v19 = vld [vmem:[#allocation2 + $0xd68] sm:$0xff]  ;;  %v4962_v20 = vcombine.low %v632_v5, %v636_v6  ;;  %v688_v6 = vld [vmem:[#allocation2 + $0xec0] sm:$0xff] }
  0xfe   : > { %3442 = vmatprep.subr.bf16.mxu0 %v4915_v21  ;;  %3614 = vmatprep.subr.bf16.mxu1 %v4917_v22  ;;  %v4964_v21 = vcombine.low %v633_v7, %v637_v8  ;;  %v4971_v22 = vcombine.high %v640_v13, %v644_v14  ;;  %v4973_v23 = vcombine.high %v641_v16, %v645_v19  ;;  %v692_v7 = vld [vmem:[#allocation2 + $0xee0] sm:$0xff]  ;;  %v689_v8 = vld [vmem:[#allocation2 + $0xec8] sm:$0xff] }
 0x101   : > { %3443 = vmatpush1.bf16.msra.mxu0 %v4914_v26  ;;  %3615 = vmatpush1.bf16.msra.mxu1 %v4916_v28  ;;  %v653_v26 = vld [vmem:[#allocation2 + $0xda8] sm:$0xff]  ;;  %v4970_v28 = vcombine.low %v640_v13, %v644_v14  ;;  %v696_v14 = vld [vmem:[#allocation2 + $0xf00] sm:$0xff] }
 0x102   : > { %3444 = vmatprep.subr.bf16.mxu0 %v4923_v31  ;;  %3616 = vmatprep.subr.bf16.mxu1 %v4925_v32  ;;  %v4972_v31 = vcombine.low %v641_v16, %v645_v19  ;;  %v4979_v32 = vcombine.high %v648_v24, %v652_v25  ;;  %v4981_v33 = vcombine.high %v649_v54, %v653_v26  ;;  %v700_v16 = vld [vmem:[#allocation2 + $0xf20] sm:$0xff]  ;;  %v697_v19 = vld [vmem:[#allocation2 + $0xf08] sm:$0xff] }
 0x105   : > { %3445 = vmatpush1.bf16.msra.mxu0 %v4922_v17  ;;  %3617 = vmatpush1.bf16.msra.mxu1 %v4924_v18  ;;  %v661_v17 = vld [vmem:[#allocation2 + $0xde8] sm:$0xff]  ;;  %v4978_v18 = vcombine.low %v648_v24, %v652_v25  ;;  %v704_v25 = vld [vmem:[#allocation2 + $0xf40] sm:$0xff] }
 0x106   : > { %3457 = vmatprep.subr.bf16.mxu0 %v4931_v38  ;;  %3629 = vmatprep.subr.bf16.mxu1 %v4933_v39  ;;  %v4980_v38 = vcombine.low %v649_v54, %v653_v26  ;;  %v4987_v39 = vcombine.high %v656_v34, %v660_v35  ;;  %v4989_v40 = vcombine.high %v657_v36, %v661_v17  ;;  %v708_v54 = vld [vmem:[#allocation2 + $0xf60] sm:$0xff]  ;;  %v705_v26 = vld [vmem:[#allocation2 + $0xf48] sm:$0xff] }
 0x108   : > { %3447 = vmatmul.mubr.bf16.vlgmr.msra.gmra.mrb[0].mxu0 %v5513_v43  ;;  %3619 = vmatmul.mubr.bf16.vlgmr.msra.gmra.mrb[0].mxu1 %v5513_v43 }
 0x109   : > { %3458 = vmatpush1.bf16.msra.mxu0 %v4930_v47  ;;  %3630 = vmatpush1.bf16.msra.mxu1 %v4932_v48  ;;  %v669_v47 = vld [vmem:[#allocation2 + $0xe28] sm:$0xff]  ;;  %v4986_v48 = vcombine.low %v656_v34, %v660_v35  ;;  %v712_v35 = vld [vmem:[#allocation2 + $0xf80] sm:$0xff] }
 0x10a   : > { %3459 = vmatprep.subr.bf16.mxu0 %v4939_v49  ;;  %3631 = vmatprep.subr.bf16.mxu1 %v4941_v50  ;;  %v4988_v49 = vcombine.low %v657_v36, %v661_v17  ;;  %v4995_v50 = vcombine.high %v664_v41, %v668_v42  ;;  %v4997_v51 = vcombine.high %v665_v44, %v669_v47  ;;  %v716_v36 = vld [vmem:[#allocation2 + $0xfa0] sm:$0xff]  ;;  %v713_v17 = vld [vmem:[#allocation2 + $0xf88] sm:$0xff] }
 0x10b   : > { %3489 = vmatprep.mubr.bf16.mxu0 %v5523_v55  ;;  %3661 = vmatprep.mubr.bf16.mxu1 %v5523_v55 }
 0x10d   : > { %3460 = vmatpush1.bf16.msra.mxu0 %v4938_v56  ;;  %3632 = vmatpush1.bf16.msra.mxu1 %v4940_v57  ;;  %v677_v56 = vld [vmem:[#allocation2 + $0xe68] sm:$0xff]  ;;  %v4994_v57 = vcombine.low %v664_v41, %v668_v42  ;;  %v720_v42 = vld [vmem:[#allocation2 + $0xfc0] sm:$0xff] }
 0x10e   : > { %3461 = vmatprep.subr.bf16.mxu0 %v4947_v59  ;;  %3633 = vmatprep.subr.bf16.mxu1 %v4949_v60  ;;  %v4996_v59 = vcombine.low %v665_v44, %v669_v47  ;;  %v5003_v60 = vcombine.high %v672_v52, %v676_v29  ;;  %v5005_v61 = vcombine.high %v673_v30, %v677_v56  ;;  %v724_v44 = vld [vmem:[#allocation2 + $0xfe0] sm:$0xff]  ;;  %v721_v47 = vld [vmem:[#allocation2 + $0xfc8] sm:$0xff] }
 0x111   : > { %3462 = vmatpush1.bf16.msra.mxu0 %v4946_v1  ;;  %3634 = vmatpush1.bf16.msra.mxu1 %v4948_v2  ;;  %v685_v1 = vld [vmem:[#allocation2 + $0xea8] sm:$0xff]  ;;  %v5002_v2 = vcombine.low %v672_v52, %v676_v29  ;;  %v218_v29 = vld [vmem:[#allocation2 + $0x10] sm:$0xff] }
 0x112   : > { %3463 = vmatprep.subr.bf16.mxu0 %v4955_v3  ;;  %3635 = vmatprep.subr.bf16.mxu1 %v4957_v4  ;;  %v5004_v3 = vcombine.low %v673_v30, %v677_v56  ;;  %v5011_v4 = vcombine.high %v680_v62, %v684_v63  ;;  %v5013_v5 = vcombine.high %v681_v0, %v685_v1  ;;  %v222_v30 = vld [vmem:[#allocation2 + $0x30] sm:$0xff]  ;;  %v219_v56 = vld [vmem:[#allocation2 + $0x18] sm:$0xff] }
 0x115   : > { %3464 = vmatpush1.bf16.msra.mxu0 %v4954_v9  ;;  %3636 = vmatpush1.bf16.msra.mxu1 %v4956_v10  ;;  %v693_v9 = vld [vmem:[#allocation2 + $0xee8] sm:$0xff]  ;;  %v5010_v10 = vcombine.low %v680_v62, %v684_v63  ;;  %v226_v63 = vld [vmem:[#allocation2 + $0x50] sm:$0xff] }
 0x116   : > { %3465 = vmatprep.subr.bf16.mxu0 %v4963_v11  ;;  %3637 = vmatprep.subr.bf16.mxu1 %v4965_v12  ;;  %v5012_v11 = vcombine.low %v681_v0, %v685_v1  ;;  %v5019_v12 = vcombine.high %v688_v6, %v692_v7  ;;  %v5021_v13 = vcombine.high %v689_v8, %v693_v9  ;;  %v230_v0 = vld [vmem:[#allocation2 + $0x70] sm:$0xff] }
 0x117   : > { %v5531_v1 = vcombine.low %v5516_v45, %v5519_v46  ;;  %v4558_v45 = vcombine.low %v226_v63, %v230_v0 }
 0x119   : > { %3466 = vmatpush1.bf16.msra.mxu0 %v4962_v20  ;;  %3638 = vmatpush1.bf16.msra.mxu1 %v4964_v21  ;;  %v701_v20 = vld [vmem:[#allocation2 + $0xf28] sm:$0xff]  ;;  %v5018_v21 = vcombine.low %v688_v6, %v692_v7  ;;  %v4559_v6 = vcombine.high %v226_v63, %v230_v0  ;;  %v286_v63 = vld [vmem:[#allocation2 + $0x230] sm:$0xff]  ;;  %v283_v0 = vld [vmem:[#allocation2 + $0x218] sm:$0xff] }
 0x11a   : > { %3467 = vmatprep.subr.bf16.mxu0 %v4971_v22  ;;  %3639 = vmatprep.subr.bf16.mxu1 %v4973_v23  ;;  %v5020_v22 = vcombine.low %v689_v8, %v693_v9  ;;  %v5027_v23 = vcombine.high %v696_v14, %v700_v16  ;;  %v5029_v24 = vcombine.high %v697_v19, %v701_v20  ;;  %v234_v8 = vld [vmem:[#allocation2 + $0x90] sm:$0xff] }
 0x11b   : > { %v238_v9 = vld [vmem:[#allocation2 + $0xb0] sm:$0xff] }
 0x11d   : > { %3468 = vmatpush1.bf16.msra.mxu0 %v4970_v28  ;;  %3640 = vmatpush1.bf16.msra.mxu1 %v4972_v31  ;;  %v709_v28 = vld [vmem:[#allocation2 + $0xf68] sm:$0xff]  ;;  %v5026_v31 = vcombine.low %v696_v14, %v700_v16  ;;  %v242_v14 = vld [vmem:[#allocation2 + $0xd0] sm:$0xff] }
 0x11e   : > { %3469 = vmatprep.subr.bf16.mxu0 %v4979_v32  ;;  %3641 = vmatprep.subr.bf16.mxu1 %v4981_v33  ;;  %v5028_v32 = vcombine.low %v697_v19, %v701_v20  ;;  %v5035_v33 = vcombine.high %v704_v25, %v708_v54  ;;  %v5037_v34 = vcombine.high %v705_v26, %v709_v28  ;;  %v246_v16 = vld [vmem:[#allocation2 + $0xf0] sm:$0xff]  ;;  %v243_v19 = vld [vmem:[#allocation2 + $0xd8] sm:$0xff] }
 0x11f   : > { %v247_v20 = vld [vmem:[#allocation2 + $0xf8] sm:$0xff] }
 0x121   : > { %3470 = vmatpush1.bf16.msra.mxu0 %v4978_v18  ;;  %3642 = vmatpush1.bf16.msra.mxu1 %v4980_v38  ;;  %v717_v18 = vld [vmem:[#allocation2 + $0xfa8] sm:$0xff]  ;;  %v5034_v38 = vcombine.low %v704_v25, %v708_v54  ;;  %v250_v25 = vld [vmem:[#allocation2 + $0x110] sm:$0xff] }
 0x122   : > { %3471 = vmatprep.subr.bf16.mxu0 %v4987_v39  ;;  %3643 = vmatprep.subr.bf16.mxu1 %v4989_v40  ;;  %v5036_v39 = vcombine.low %v705_v26, %v709_v28  ;;  %v5043_v40 = vcombine.high %v712_v35, %v716_v36  ;;  %v5045_v41 = vcombine.high %v713_v17, %v717_v18  ;;  %v254_v54 = vld [vmem:[#allocation2 + $0x130] sm:$0xff]  ;;  %v251_v26 = vld [vmem:[#allocation2 + $0x118] sm:$0xff] }
 0x123   : > { %v255_v28 = vld [vmem:[#allocation2 + $0x138] sm:$0xff] }
 0x125   : > { %3472 = vmatpush1.bf16.msra.mxu0 %v4986_v48  ;;  %3644 = vmatpush1.bf16.msra.mxu1 %v4988_v49  ;;  %v725_v48 = vld [vmem:[#allocation2 + $0xfe8] sm:$0xff]  ;;  %v5042_v49 = vcombine.low %v712_v35, %v716_v36  ;;  %v262_v35 = vld [vmem:[#allocation2 + $0x170] sm:$0xff]  ;;  %v259_v36 = vld [vmem:[#allocation2 + $0x158] sm:$0xff] }
 0x126   : > { %3473 = vmatprep.subr.bf16.mxu0 %v4995_v50  ;;  %3645 = vmatprep.subr.bf16.mxu1 %v4997_v51  ;;  %v5044_v50 = vcombine.low %v713_v17, %v717_v18  ;;  %v5051_v51 = vcombine.high %v720_v42, %v724_v44  ;;  %v5053_v52 = vcombine.high %v721_v47, %v725_v48  ;;  %v263_v17 = vld [vmem:[#allocation2 + $0x178] sm:$0xff] }
 0x127   : > { %v4582_v18 = vcombine.low %v250_v25, %v254_v54 }
 0x129   : > { %3474 = vmatpush1.bf16.msra.mxu0 %v4994_v57  ;;  %3646 = vmatpush1.bf16.msra.mxu1 %v4996_v59  ;;  %v223_v57 = vld [vmem:[#allocation2 + $0x38] sm:$0xff]  ;;  %v5050_v59 = vcombine.low %v720_v42, %v724_v44  ;;  %v270_v42 = vld [vmem:[#allocation2 + $0x1b0] sm:$0xff] }
 0x12a   : > { %3475 = vmatprep.subr.bf16.mxu0 %v5003_v60  ;;  %3647 = vmatprep.subr.bf16.mxu1 %v5005_v61  ;;  %v5052_v60 = vcombine.low %v721_v47, %v725_v48  ;;  %v4551_v61 = vcombine.high %v218_v29, %v222_v30  ;;  %v4553_v62 = vcombine.high %v219_v56, %v223_v57  ;;  %v267_v44 = vld [vmem:[#allocation2 + $0x198] sm:$0xff] }
 0x12b   : > { %v271_v47 = vld [vmem:[#allocation2 + $0x1b8] sm:$0xff] }
 0x12d   : > { %3476 = vmatpush1.bf16.msra.mxu0 %v5002_v2  ;;  %3648 = vmatpush1.bf16.msra.mxu1 %v5004_v3  ;;  %v227_v2 = vld [vmem:[#allocation2 + $0x58] sm:$0xff] }
 0x12e   : > { %3477 = vmatprep.subr.bf16.mxu0 %v5011_v4  ;;  %3649 = vmatprep.subr.bf16.mxu1 %v5013_v5  ;;  %v231_v3 = vld [vmem:[#allocation2 + $0x78] sm:$0xff]  ;;  %v4550_v4 = vcombine.low %v218_v29, %v222_v30  ;;  %v4552_v5 = vcombine.low %v219_v56, %v223_v57  ;;  %v278_v29 = vld [vmem:[#allocation2 + $0x1f0] sm:$0xff] }
 0x12f   : > { %v4561_v7 = vcombine.high %v227_v2, %v231_v3  ;;  %v4560_v46 = vcombine.low %v227_v2, %v231_v3  ;;  %v275_v30 = vld [vmem:[#allocation2 + $0x1d8] sm:$0xff] }
 0x130   : > { %v279_v56 = vld [vmem:[#allocation2 + $0x1f8] sm:$0xff] }
 0x131   : > { %3478 = vmatpush1.bf16.msra.mxu0 %v5010_v10  ;;  %3650 = vmatpush1.bf16.msra.mxu1 %v5012_v11  ;;  %v235_v10 = vld [vmem:[#allocation2 + $0x98] sm:$0xff] }
 0x132   : > { %3479 = vmatprep.subr.bf16.mxu0 %v5019_v12  ;;  %3651 = vmatprep.subr.bf16.mxu1 %v5021_v13  ;;  %v239_v11 = vld [vmem:[#allocation2 + $0xb8] sm:$0xff]  ;;  %v4567_v12 = vcombine.high %v234_v8, %v238_v9 }
 0x133   : > { %v4569_v13 = vcombine.high %v235_v10, %v239_v11  ;;  %v287_v2 = vld [vmem:[#allocation2 + $0x238] sm:$0xff] }
 0x135   : > { %3480 = vmatpush1.bf16.msra.mxu0 %v5018_v21  ;;  %3652 = vmatpush1.bf16.msra.mxu1 %v5020_v22  ;;  %v4566_v21 = vcombine.low %v234_v8, %v238_v9  ;;  %v4568_v22 = vcombine.low %v235_v10, %v239_v11  ;;  %v294_v8 = vld [vmem:[#allocation2 + $0x270] sm:$0xff]  ;;  %v291_v9 = vld [vmem:[#allocation2 + $0x258] sm:$0xff] }
 0x136   : > { %3481 = vmatprep.subr.bf16.mxu0 %v5027_v23  ;;  %3653 = vmatprep.subr.bf16.mxu1 %v5029_v24  ;;  %v4575_v23 = vcombine.high %v242_v14, %v246_v16  ;;  %v4577_v24 = vcombine.high %v243_v19, %v247_v20  ;;  %v295_v10 = vld [vmem:[#allocation2 + $0x278] sm:$0xff] }
 0x139   : > { %3482 = vmatpush1.bf16.msra.mxu0 %v5026_v31  ;;  %3654 = vmatpush1.bf16.msra.mxu1 %v5028_v32  ;;  %v4574_v31 = vcombine.low %v242_v14, %v246_v16  ;;  %v4576_v32 = vcombine.low %v243_v19, %v247_v20  ;;  %v302_v14 = vld [vmem:[#allocation2 + $0x2b0] sm:$0xff]  ;;  %v299_v16 = vld [vmem:[#allocation2 + $0x298] sm:$0xff] }
 0x13a   : > { %3483 = vmatprep.subr.bf16.mxu0 %v5035_v33  ;;  %3655 = vmatprep.subr.bf16.mxu1 %v5037_v34  ;;  %v4583_v33 = vcombine.high %v250_v25, %v254_v54  ;;  %v258_v34 = vld [vmem:[#allocation2 + $0x150] sm:$0xff]  ;;  %v303_v19 = vld [vmem:[#allocation2 + $0x2b8] sm:$0xff] }
 0x13b   : > { %v4590_v48 = vcombine.low %v258_v34, %v262_v35  ;;  %v310_v25 = vld [vmem:[#allocation2 + $0x2f0] sm:$0xff]  ;;  %v307_v54 = vld [vmem:[#allocation2 + $0x2d8] sm:$0xff] }
 0x13d   : > { %3484 = vmatpush1.bf16.msra.mxu0 %v5034_v38  ;;  %3656 = vmatpush1.bf16.msra.mxu1 %v5036_v39  ;;  %v4584_v38 = vcombine.low %v251_v26, %v255_v28  ;;  %v4591_v39 = vcombine.high %v258_v34, %v262_v35  ;;  %v318_v34 = vld [vmem:[#allocation2 + $0x330] sm:$0xff]  ;;  %v315_v35 = vld [vmem:[#allocation2 + $0x318] sm:$0xff] }
 0x13e   : > { %3485 = vmatprep.subr.bf16.mxu0 %v5043_v40  ;;  %3657 = vmatprep.subr.bf16.mxu1 %v5045_v41  ;;  %v4593_v40 = vcombine.high %v259_v36, %v263_v17  ;;  %v266_v41 = vld [vmem:[#allocation2 + $0x190] sm:$0xff] }
 0x13f   : > { %v4598_v57 = vcombine.low %v266_v41, %v270_v42 }
 0x141   : > { %3486 = vmatpush1.bf16.msra.mxu0 %v5042_v49  ;;  %3658 = vmatpush1.bf16.msra.mxu1 %v5044_v50  ;;  %v4592_v49 = vcombine.low %v259_v36, %v263_v17  ;;  %v4599_v50 = vcombine.high %v266_v41, %v270_v42  ;;  %v319_v36 = vld [vmem:[#allocation2 + $0x338] sm:$0xff]  ;;  %v326_v41 = vld [vmem:[#allocation2 + $0x370] sm:$0xff] }
 0x142   : > { %3487 = vmatprep.subr.bf16.mxu0 %v5051_v51  ;;  %3659 = vmatprep.subr.bf16.mxu1 %v5053_v52  ;;  %v4601_v51 = vcombine.high %v267_v44, %v271_v47  ;;  %v274_v52 = vld [vmem:[#allocation2 + $0x1d0] sm:$0xff]  ;;  %v323_v42 = vld [vmem:[#allocation2 + $0x358] sm:$0xff] }
 0x143   : > { %v4606_v3 = vcombine.low %v274_v52, %v278_v29 }
 0x145   : > { %3488 = vmatpush1.bf16.msra.mxu0 %v5050_v59  ;;  %3660 = vmatpush1.bf16.msra.mxu1 %v5052_v60  ;;  %v4600_v59 = vcombine.low %v267_v44, %v271_v47  ;;  %v4607_v60 = vcombine.high %v274_v52, %v278_v29  ;;  %v327_v44 = vld [vmem:[#allocation2 + $0x378] sm:$0xff]  ;;  %v334_v52 = vld [vmem:[#allocation2 + $0x3b0] sm:$0xff] }
 0x146   : > { %3672 = vmatprep.subr.bf16.mxu0 %v4551_v61  ;;  %3844 = vmatprep.subr.bf16.mxu1 %v4553_v62  ;;  %v4609_v61 = vcombine.high %v275_v30, %v279_v56  ;;  %v282_v62 = vld [vmem:[#allocation2 + $0x210] sm:$0xff]  ;;  %v331_v29 = vld [vmem:[#allocation2 + $0x398] sm:$0xff] }
 0x147   : > { %v4614_v11 = vcombine.low %v282_v62, %v286_v63 }
 0x148   : > { %3490 = vmatmul.mubr.bf16.vlgmr.msra.gmra.mrb[0].mxu0 %v5531_v1  ;;  %3662 = vmatmul.mubr.bf16.vlgmr.msra.gmra.mrb[0].mxu1 %v5531_v1 }
 0x149   : > { %3673 = vmatpush1.bf16.msra.mxu0 %v4550_v4  ;;  %3845 = vmatpush1.bf16.msra.mxu1 %v4552_v5  ;;  %v4608_v4 = vcombine.low %v275_v30, %v279_v56  ;;  %v4615_v5 = vcombine.high %v282_v62, %v286_v63  ;;  %v335_v30 = vld [vmem:[#allocation2 + $0x3b8] sm:$0xff]  ;;  %v342_v62 = vld [vmem:[#allocation2 + $0x3f0] sm:$0xff] }
 0x14a   : > { %3674 = vmatprep.subr.bf16.mxu0 %v4559_v6  ;;  %3846 = vmatprep.subr.bf16.mxu1 %v4561_v7  ;;  %v4617_v6 = vcombine.high %v283_v0, %v287_v2  ;;  %v290_v7 = vld [vmem:[#allocation2 + $0x250] sm:$0xff]  ;;  %v339_v63 = vld [vmem:[#allocation2 + $0x3d8] sm:$0xff] }
 0x14b   : > { %3704 = vmatprep.mubr.bf16.mxu0 %v5471_v58  ;;  %3876 = vmatprep.mubr.bf16.mxu1 %v5471_v58  ;;  %v4585_v58 = vcombine.high %v251_v26, %v255_v28  ;;  %v4622_v20 = vcombine.low %v290_v7, %v294_v8  ;;  %v311_v26 = vld [vmem:[#allocation2 + $0x2f8] sm:$0xff] }
 0x14d   : > { %3675 = vmatpush1.bf16.msra.mxu0 %v4558_v45  ;;  %3847 = vmatpush1.bf16.msra.mxu1 %v4560_v46  ;;  %v4616_v45 = vcombine.low %v283_v0, %v287_v2  ;;  %v4623_v46 = vcombine.high %v290_v7, %v294_v8  ;;  %v343_v0 = vld [vmem:[#allocation2 + $0x3f8] sm:$0xff]  ;;  %v350_v7 = vld [vmem:[#allocation2 + $0x430] sm:$0xff] }
 0x14e   : > { %3676 = vmatprep.subr.bf16.mxu0 %v4567_v12  ;;  %3848 = vmatprep.subr.bf16.mxu1 %v4569_v13  ;;  %v4625_v12 = vcombine.high %v291_v9, %v295_v10  ;;  %v298_v13 = vld [vmem:[#allocation2 + $0x290] sm:$0xff]  ;;  %v347_v8 = vld [vmem:[#allocation2 + $0x418] sm:$0xff] }
 0x14f   : > { %v4630_v28 = vcombine.low %v298_v13, %v302_v14 }
 0x151   : > { %3677 = vmatpush1.bf16.msra.mxu0 %v4566_v21  ;;  %3849 = vmatpush1.bf16.msra.mxu1 %v4568_v22  ;;  %v4624_v21 = vcombine.low %v291_v9, %v295_v10  ;;  %v4631_v22 = vcombine.high %v298_v13, %v302_v14  ;;  %v351_v9 = vld [vmem:[#allocation2 + $0x438] sm:$0xff]  ;;  %v358_v13 = vld [vmem:[#allocation2 + $0x470] sm:$0xff] }
 0x152   : > { %3678 = vmatprep.subr.bf16.mxu0 %v4575_v23  ;;  %3850 = vmatprep.subr.bf16.mxu1 %v4577_v24  ;;  %v4633_v23 = vcombine.high %v299_v16, %v303_v19  ;;  %v306_v24 = vld [vmem:[#allocation2 + $0x2d0] sm:$0xff]  ;;  %v355_v14 = vld [vmem:[#allocation2 + $0x458] sm:$0xff] }
 0x153   : > { %v4638_v17 = vcombine.low %v306_v24, %v310_v25 }
 0x155   : > { %3679 = vmatpush1.bf16.msra.mxu0 %v4574_v31  ;;  %3851 = vmatpush1.bf16.msra.mxu1 %v4576_v32  ;;  %v4632_v31 = vcombine.low %v299_v16, %v303_v19  ;;  %v4639_v32 = vcombine.high %v306_v24, %v310_v25  ;;  %v359_v16 = vld [vmem:[#allocation2 + $0x478] sm:$0xff]  ;;  %v366_v24 = vld [vmem:[#allocation2 + $0x4b0] sm:$0xff] }
 0x156   : > { %3680 = vmatprep.subr.bf16.mxu0 %v4583_v33  ;;  %3852 = vmatprep.subr.bf16.mxu1 %v4585_v58  ;;  %v4641_v33 = vcombine.high %v307_v54, %v311_v26  ;;  %v314_v58 = vld [vmem:[#allocation2 + $0x310] sm:$0xff]  ;;  %v363_v25 = vld [vmem:[#allocation2 + $0x498] sm:$0xff] }
 0x157   : > { %v4646_v47 = vcombine.low %v314_v58, %v318_v34 }
 0x159   : > { %3681 = vmatpush1.bf16.msra.mxu0 %v4582_v18  ;;  %3853 = vmatpush1.bf16.msra.mxu1 %v4584_v38  ;;  %v4640_v18 = vcombine.low %v307_v54, %v311_v26  ;;  %v4647_v38 = vcombine.high %v314_v58, %v318_v34  ;;  %v367_v54 = vld [vmem:[#allocation2 + $0x4b8] sm:$0xff]  ;;  %v374_v58 = vld [vmem:[#allocation2 + $0x4f0] sm:$0xff] }
 0x15a   : > { %3682 = vmatprep.subr.bf16.mxu0 %v4591_v39  ;;  %3854 = vmatprep.subr.bf16.mxu1 %v4593_v40  ;;  %v4649_v39 = vcombine.high %v315_v35, %v319_v36  ;;  %v322_v40 = vld [vmem:[#allocation2 + $0x350] sm:$0xff]  ;;  %v371_v34 = vld [vmem:[#allocation2 + $0x4d8] sm:$0xff] }
 0x15b   : > { %v4654_v56 = vcombine.low %v322_v40, %v326_v41 }
 0x15d   : > { %3683 = vmatpush1.bf16.msra.mxu0 %v4590_v48  ;;  %3855 = vmatpush1.bf16.msra.mxu1 %v4592_v49  ;;  %v4648_v48 = vcombine.low %v315_v35, %v319_v36  ;;  %v4655_v49 = vcombine.high %v322_v40, %v326_v41  ;;  %v375_v35 = vld [vmem:[#allocation2 + $0x4f8] sm:$0xff] }
 0x15e   : > { %3684 = vmatprep.subr.bf16.mxu0 %v4599_v50  ;;  %3856 = vmatprep.subr.bf16.mxu1 %v4601_v51  ;;  %v4657_v50 = vcombine.high %v323_v42, %v327_v44  ;;  %v330_v51 = vld [vmem:[#allocation2 + $0x390] sm:$0xff]  ;;  %v379_v40 = vld [vmem:[#allocation2 + $0x518] sm:$0xff] }
 0x15f   : > { %v4662_v2 = vcombine.low %v330_v51, %v334_v52  ;;  %v383_v41 = vld [vmem:[#allocation2 + $0x538] sm:$0xff] }
 0x161   : > { %3685 = vmatpush1.bf16.msra.mxu0 %v4598_v57  ;;  %3857 = vmatpush1.bf16.msra.mxu1 %v4600_v59  ;;  %v4656_v57 = vcombine.low %v323_v42, %v327_v44  ;;  %v4663_v59 = vcombine.high %v330_v51, %v334_v52  ;;  %v4704_v44 = vcombine.low %v371_v34, %v375_v35  ;;  %v391_v51 = vld [vmem:[#allocation2 + $0x578] sm:$0xff] }
 0x162   : > { %3686 = vmatprep.subr.bf16.mxu0 %v4607_v60  ;;  %3858 = vmatprep.subr.bf16.mxu1 %v4609_v61  ;;  %v4665_v60 = vcombine.high %v331_v29, %v335_v30  ;;  %v338_v61 = vld [vmem:[#allocation2 + $0x3d0] sm:$0xff] }
 0x163   : > { %v4670_v10 = vcombine.low %v338_v61, %v342_v62 }
 0x165   : > { %3687 = vmatpush1.bf16.msra.mxu0 %v4606_v3  ;;  %3859 = vmatpush1.bf16.msra.mxu1 %v4608_v4  ;;  %v4664_v3 = vcombine.low %v331_v29, %v335_v30  ;;  %v4671_v4 = vcombine.high %v338_v61, %v342_v62  ;;  %v4712_v29 = vcombine.low %v379_v40, %v383_v41  ;;  %v399_v61 = vld [vmem:[#allocation2 + $0x5b8] sm:$0xff] }
 0x166   : > { %3688 = vmatprep.subr.bf16.mxu0 %v4615_v5  ;;  %3860 = vmatprep.subr.bf16.mxu1 %v4617_v6  ;;  %v4673_v5 = vcombine.high %v339_v63, %v343_v0  ;;  %v346_v6 = vld [vmem:[#allocation2 + $0x410] sm:$0xff] }
 0x167   : > { %v4678_v19 = vcombine.low %v346_v6, %v350_v7 }
 0x169   : > { %3689 = vmatpush1.bf16.msra.mxu0 %v4614_v11  ;;  %3861 = vmatpush1.bf16.msra.mxu1 %v4616_v45  ;;  %v4672_v11 = vcombine.low %v339_v63, %v343_v0  ;;  %v4679_v45 = vcombine.high %v346_v6, %v350_v7  ;;  %v407_v6 = vld [vmem:[#allocation2 + $0x5f8] sm:$0xff] }
 0x16a   : > { %3690 = vmatprep.subr.bf16.mxu0 %v4623_v46  ;;  %3862 = vmatprep.subr.bf16.mxu1 %v4625_v12  ;;  %v4681_v46 = vcombine.high %v347_v8, %v351_v9  ;;  %v354_v12 = vld [vmem:[#allocation2 + $0x450] sm:$0xff] }
 0x16b   : > { %v4686_v26 = vcombine.low %v354_v12, %v358_v13 }
 0x16d   : > { %3691 = vmatpush1.bf16.msra.mxu0 %v4622_v20  ;;  %3863 = vmatpush1.bf16.msra.mxu1 %v4624_v21  ;;  %v4680_v20 = vcombine.low %v347_v8, %v351_v9  ;;  %v4687_v21 = vcombine.high %v354_v12, %v358_v13  ;;  %v415_v12 = vld [vmem:[#allocation2 + $0x638] sm:$0xff] }
 0x16e   : > { %3692 = vmatprep.subr.bf16.mxu0 %v4631_v22  ;;  %3864 = vmatprep.subr.bf16.mxu1 %v4633_v23  ;;  %v4689_v22 = vcombine.high %v355_v14, %v359_v16  ;;  %v362_v23 = vld [vmem:[#allocation2 + $0x490] sm:$0xff] }
 0x16f   : > { %v4694_v36 = vcombine.low %v362_v23, %v366_v24 }
 0x171   : > { %3693 = vmatpush1.bf16.msra.mxu0 %v4630_v28  ;;  %3865 = vmatpush1.bf16.msra.mxu1 %v4632_v31  ;;  %v4688_v28 = vcombine.low %v355_v14, %v359_v16  ;;  %v4695_v31 = vcombine.high %v362_v23, %v366_v24  ;;  %v423_v23 = vld [vmem:[#allocation2 + $0x678] sm:$0xff] }
 0x172   : > { %3694 = vmatprep.subr.bf16.mxu0 %v4639_v32  ;;  %3866 = vmatprep.subr.bf16.mxu1 %v4641_v33  ;;  %v4697_v32 = vcombine.high %v363_v25, %v367_v54  ;;  %v370_v33 = vld [vmem:[#allocation2 + $0x4d0] sm:$0xff] }
 0x173   : > { %v4702_v42 = vcombine.low %v370_v33, %v374_v58 }
 0x175   : > { %3695 = vmatpush1.bf16.msra.mxu0 %v4638_v17  ;;  %3867 = vmatpush1.bf16.msra.mxu1 %v4640_v18  ;;  %v4703_v17 = vcombine.high %v370_v33, %v374_v58  ;;  %v4705_v18 = vcombine.high %v371_v34, %v375_v35  ;;  %v431_v33 = vld [vmem:[#allocation2 + $0x6b8] sm:$0xff] }
 0x176   : > { %3696 = vmatprep.subr.bf16.mxu0 %v4647_v38  ;;  %3868 = vmatprep.subr.bf16.mxu1 %v4649_v39  ;;  %v378_v38 = vld [vmem:[#allocation2 + $0x510] sm:$0xff] }
 0x177   : > { %v382_v39 = vld [vmem:[#allocation2 + $0x530] sm:$0xff] }
 0x178   : > { %v4710_v52 = vcombine.low %v378_v38, %v382_v39 }
 0x179   : > { %3697 = vmatpush1.bf16.msra.mxu0 %v4646_v47  ;;  %3869 = vmatpush1.bf16.msra.mxu1 %v4648_v48  ;;  %v4711_v47 = vcombine.high %v378_v38, %v382_v39  ;;  %v386_v48 = vld [vmem:[#allocation2 + $0x550] sm:$0xff]  ;;  %v439_v38 = vld [vmem:[#allocation2 + $0x6f8] sm:$0xff] }
 0x17a   : > { %3698 = vmatprep.subr.bf16.mxu0 %v4655_v49  ;;  %3870 = vmatprep.subr.bf16.mxu1 %v4657_v50  ;;  %v390_v49 = vld [vmem:[#allocation2 + $0x570] sm:$0xff]  ;;  %v387_v50 = vld [vmem:[#allocation2 + $0x558] sm:$0xff] }
 0x17b   : > { %v4719_v30 = vcombine.high %v386_v48, %v390_v49  ;;  %v4718_v62 = vcombine.low %v386_v48, %v390_v49  ;;  %v4720_v63 = vcombine.low %v387_v50, %v391_v51  ;;  %v447_v48 = vld [vmem:[#allocation2 + $0x738] sm:$0xff] }
 0x17d   : > { %3699 = vmatpush1.bf16.msra.mxu0 %v4654_v56  ;;  %3871 = vmatpush1.bf16.msra.mxu1 %v4656_v57  ;;  %v4721_v56 = vcombine.high %v387_v50, %v391_v51  ;;  %v394_v57 = vld [vmem:[#allocation2 + $0x590] sm:$0xff] }
 0x17e   : > { %3700 = vmatprep.subr.bf16.mxu0 %v4663_v59  ;;  %3872 = vmatprep.subr.bf16.mxu1 %v4665_v60  ;;  %v398_v59 = vld [vmem:[#allocation2 + $0x5b0] sm:$0xff]  ;;  %v395_v60 = vld [vmem:[#allocation2 + $0x598] sm:$0xff] }
 0x17f   : > { %v4727_v0 = vcombine.high %v394_v57, %v398_v59  ;;  %v4726_v7 = vcombine.low %v394_v57, %v398_v59  ;;  %v4728_v8 = vcombine.low %v395_v60, %v399_v61  ;;  %v455_v57 = vld [vmem:[#allocation2 + $0x778] sm:$0xff] }
 0x181   : > { %3701 = vmatpush1.bf16.msra.mxu0 %v4662_v2  ;;  %3873 = vmatpush1.bf16.msra.mxu1 %v4664_v3  ;;  %v4729_v2 = vcombine.high %v395_v60, %v399_v61  ;;  %v402_v3 = vld [vmem:[#allocation2 + $0x5d0] sm:$0xff] }
 0x182   : > { %3702 = vmatprep.subr.bf16.mxu0 %v4671_v4  ;;  %3874 = vmatprep.subr.bf16.mxu1 %v4673_v5  ;;  %v406_v4 = vld [vmem:[#allocation2 + $0x5f0] sm:$0xff]  ;;  %v403_v5 = vld [vmem:[#allocation2 + $0x5d8] sm:$0xff] }
 0x183   : > { %v4735_v9 = vcombine.high %v402_v3, %v406_v4  ;;  %v4734_v13 = vcombine.low %v402_v3, %v406_v4  ;;  %v4736_v14 = vcombine.low %v403_v5, %v407_v6  ;;  %v463_v3 = vld [vmem:[#allocation2 + $0x7b8] sm:$0xff] }
 0x185   : > { %3703 = vmatpush1.bf16.msra.mxu0 %v4670_v10  ;;  %3875 = vmatpush1.bf16.msra.mxu1 %v4672_v11  ;;  %v4737_v10 = vcombine.high %v403_v5, %v407_v6  ;;  %v410_v11 = vld [vmem:[#allocation2 + $0x610] sm:$0xff] }
 0x186   : > { %3715 = vmatprep.subr.bf16.mxu0 %v4679_v45  ;;  %3887 = vmatprep.subr.bf16.mxu1 %v4681_v46  ;;  %v414_v45 = vld [vmem:[#allocation2 + $0x630] sm:$0xff]  ;;  %v411_v46 = vld [vmem:[#allocation2 + $0x618] sm:$0xff] }
 0x187   : > { %v4743_v16 = vcombine.high %v410_v11, %v414_v45  ;;  %v4742_v24 = vcombine.low %v410_v11, %v414_v45  ;;  %v471_v11 = vld [vmem:[#allocation2 + $0x7f8] sm:$0xff] }
 0x188   : > { %3705 = vmatmul.mubr.bf16.vlgmr.msra.gmra.mrb[4].mxu0 %v5477_v15  ;;  %3877 = vmatmul.mubr.bf16.vlgmr.msra.gmra.mrb[4].mxu1 %v5477_v15  ;;  %v4696_v15 = vcombine.low %v363_v25, %v367_v54  ;;  %v4744_v25 = vcombine.low %v411_v46, %v415_v12 }
 0x189   : > { %3716 = vmatpush1.bf16.msra.mxu0 %v4678_v19  ;;  %3888 = vmatpush1.bf16.msra.mxu1 %v4680_v20  ;;  %v4745_v19 = vcombine.high %v411_v46, %v415_v12  ;;  %v418_v20 = vld [vmem:[#allocation2 + $0x650] sm:$0xff] }
 0x18a   : > { %3717 = vmatprep.subr.bf16.mxu0 %v4687_v21  ;;  %3889 = vmatprep.subr.bf16.mxu1 %v4689_v22  ;;  %v422_v21 = vld [vmem:[#allocation2 + $0x670] sm:$0xff]  ;;  %v419_v22 = vld [vmem:[#allocation2 + $0x658] sm:$0xff] }
 0x18b   : > { %3747 = vmatprep.mubr.bf16.mxu0 %v5487_v53  ;;  %3919 = vmatprep.mubr.bf16.mxu1 %v5487_v53  ;;  %v4713_v53 = vcombine.high %v379_v40, %v383_v41  ;;  %v4751_v54 = vcombine.high %v418_v20, %v422_v21  ;;  %v4750_v58 = vcombine.low %v418_v20, %v422_v21  ;;  %v479_v20 = vld [vmem:[#allocation2 + $0x838] sm:$0xff] }
 0x18c   : > { %v4752_v34 = vcombine.low %v419_v22, %v423_v23 }
 0x18d   : > { %3718 = vmatpush1.bf16.msra.mxu0 %v4686_v26  ;;  %3890 = vmatpush1.bf16.msra.mxu1 %v4688_v28  ;;  %v4753_v26 = vcombine.high %v419_v22, %v423_v23  ;;  %v426_v28 = vld [vmem:[#allocation2 + $0x690] sm:$0xff] }
 0x18e   : > { %3719 = vmatprep.subr.bf16.mxu0 %v4695_v31  ;;  %3891 = vmatprep.subr.bf16.mxu1 %v4697_v32  ;;  %v430_v31 = vld [vmem:[#allocation2 + $0x6b0] sm:$0xff]  ;;  %v427_v32 = vld [vmem:[#allocation2 + $0x698] sm:$0xff] }
 0x18f   : > { %v4759_v35 = vcombine.high %v426_v28, %v430_v31  ;;  %v4758_v39 = vcombine.low %v426_v28, %v430_v31  ;;  %v4760_v40 = vcombine.low %v427_v32, %v431_v33  ;;  %v487_v28 = vld [vmem:[#allocation2 + $0x878] sm:$0xff] }
 0x191   : > { %3720 = vmatpush1.bf16.msra.mxu0 %v4694_v36  ;;  %3892 = vmatpush1.bf16.msra.mxu1 %v4696_v15  ;;  %v4761_v36 = vcombine.high %v427_v32, %v431_v33  ;;  %v434_v15 = vld [vmem:[#allocation2 + $0x6d0] sm:$0xff] }
 0x192   : > { %3721 = vmatprep.subr.bf16.mxu0 %v4703_v17  ;;  %3893 = vmatprep.subr.bf16.mxu1 %v4705_v18  ;;  %v438_v17 = vld [vmem:[#allocation2 + $0x6f0] sm:$0xff]  ;;  %v435_v18 = vld [vmem:[#allocation2 + $0x6d8] sm:$0xff] }
 0x193   : > { %v4767_v41 = vcombine.high %v434_v15, %v438_v17  ;;  %v4766_v49 = vcombine.low %v434_v15, %v438_v17  ;;  %v4768_v50 = vcombine.low %v435_v18, %v439_v38  ;;  %v495_v15 = vld [vmem:[#allocation2 + $0x8b8] sm:$0xff] }
 0x195   : > { %3722 = vmatpush1.bf16.msra.mxu0 %v4702_v42  ;;  %3894 = vmatpush1.bf16.msra.mxu1 %v4704_v44  ;;  %v4769_v42 = vcombine.high %v435_v18, %v439_v38  ;;  %v442_v44 = vld [vmem:[#allocation2 + $0x710] sm:$0xff] }
 0x196   : > { %3723 = vmatprep.subr.bf16.mxu0 %v4711_v47  ;;  %3895 = vmatprep.subr.bf16.mxu1 %v4713_v53  ;;  %v446_v47 = vld [vmem:[#allocation2 + $0x730] sm:$0xff]  ;;  %v443_v53 = vld [vmem:[#allocation2 + $0x718] sm:$0xff] }
 0x197   : > { %v4775_v51 = vcombine.high %v442_v44, %v446_v47  ;;  %v4774_v59 = vcombine.low %v442_v44, %v446_v47  ;;  %v4776_v60 = vcombine.low %v443_v53, %v447_v48  ;;  %v503_v44 = vld [vmem:[#allocation2 + $0x8f8] sm:$0xff] }
 0x199   : > { %3724 = vmatpush1.bf16.msra.mxu0 %v4710_v52  ;;  %3896 = vmatpush1.bf16.msra.mxu1 %v4712_v29  ;;  %v4777_v52 = vcombine.high %v443_v53, %v447_v48  ;;  %v450_v29 = vld [vmem:[#allocation2 + $0x750] sm:$0xff] }
 0x19a   : > { %3725 = vmatprep.subr.bf16.mxu0 %v4719_v30  ;;  %3897 = vmatprep.subr.bf16.mxu1 %v4721_v56  ;;  %v454_v30 = vld [vmem:[#allocation2 + $0x770] sm:$0xff]  ;;  %v451_v56 = vld [vmem:[#allocation2 + $0x758] sm:$0xff] }
 0x19b   : > { %v4783_v61 = vcombine.high %v450_v29, %v454_v30  ;;  %v4782_v4 = vcombine.low %v450_v29, %v454_v30  ;;  %v4784_v5 = vcombine.low %v451_v56, %v455_v57 }
 0x19d   : > { %3726 = vmatpush1.bf16.msra.mxu0 %v4718_v62  ;;  %3898 = vmatpush1.bf16.msra.mxu1 %v4720_v63  ;;  %v4785_v62 = vcombine.high %v451_v56, %v455_v57  ;;  %v458_v63 = vld [vmem:[#allocation2 + $0x790] sm:$0xff] }
 0x19e   : > { %3727 = vmatprep.subr.bf16.mxu0 %v4727_v0  ;;  %3899 = vmatprep.subr.bf16.mxu1 %v4729_v2  ;;  %v462_v0 = vld [vmem:[#allocation2 + $0x7b0] sm:$0xff]  ;;  %v459_v2 = vld [vmem:[#allocation2 + $0x798] sm:$0xff] }
 0x19f   : > { %v4791_v6 = vcombine.high %v458_v63, %v462_v0  ;;  %v4790_v45 = vcombine.low %v458_v63, %v462_v0  ;;  %v4792_v46 = vcombine.low %v459_v2, %v463_v3  ;;  %v514_v57 = vld [vmem:[#allocation2 + $0x950] sm:$0xff] }
 0x1a1   : > { %3728 = vmatpush1.bf16.msra.mxu0 %v4726_v7  ;;  %3900 = vmatpush1.bf16.msra.mxu1 %v4728_v8  ;;  %v4793_v7 = vcombine.high %v459_v2, %v463_v3  ;;  %v466_v8 = vld [vmem:[#allocation2 + $0x7d0] sm:$0xff] }
 0x1a2   : > { %3729 = vmatprep.subr.bf16.mxu0 %v4735_v9  ;;  %3901 = vmatprep.subr.bf16.mxu1 %v4737_v10  ;;  %v470_v9 = vld [vmem:[#allocation2 + $0x7f0] sm:$0xff]  ;;  %v467_v10 = vld [vmem:[#allocation2 + $0x7d8] sm:$0xff] }
 0x1a3   : > { %v4799_v12 = vcombine.high %v466_v8, %v470_v9  ;;  %v4798_v21 = vcombine.low %v466_v8, %v470_v9  ;;  %v4800_v22 = vcombine.low %v467_v10, %v471_v11  ;;  %v522_v3 = vld [vmem:[#allocation2 + $0x990] sm:$0xff] }
 0x1a5   : > { %3730 = vmatpush1.bf16.msra.mxu0 %v4734_v13  ;;  %3902 = vmatpush1.bf16.msra.mxu1 %v4736_v14  ;;  %v4801_v13 = vcombine.high %v467_v10, %v471_v11  ;;  %v474_v14 = vld [vmem:[#allocation2 + $0x810] sm:$0xff] }
 0x1a6   : > { %3731 = vmatprep.subr.bf16.mxu0 %v4743_v16  ;;  %3903 = vmatprep.subr.bf16.mxu1 %v4745_v19  ;;  %v478_v16 = vld [vmem:[#allocation2 + $0x830] sm:$0xff]  ;;  %v475_v19 = vld [vmem:[#allocation2 + $0x818] sm:$0xff] }
 0x1a7   : > { %v4807_v23 = vcombine.high %v474_v14, %v478_v16  ;;  %v4806_v31 = vcombine.low %v474_v14, %v478_v16  ;;  %v4808_v32 = vcombine.low %v475_v19, %v479_v20  ;;  %v530_v11 = vld [vmem:[#allocation2 + $0x9d0] sm:$0xff] }
 0x1a9   : > { %3732 = vmatpush1.bf16.msra.mxu0 %v4742_v24  ;;  %3904 = vmatpush1.bf16.msra.mxu1 %v4744_v25  ;;  %v4809_v24 = vcombine.high %v475_v19, %v479_v20  ;;  %v482_v25 = vld [vmem:[#allocation2 + $0x850] sm:$0xff] }
 0x1aa   : > { %3733 = vmatprep.subr.bf16.mxu0 %v4751_v54  ;;  %3905 = vmatprep.subr.bf16.mxu1 %v4753_v26  ;;  %v486_v54 = vld [vmem:[#allocation2 + $0x870] sm:$0xff]  ;;  %v483_v26 = vld [vmem:[#allocation2 + $0x858] sm:$0xff] }
 0x1ab   : > { %v4815_v33 = vcombine.high %v482_v25, %v486_v54  ;;  %v4814_v17 = vcombine.low %v482_v25, %v486_v54  ;;  %v4816_v18 = vcombine.low %v483_v26, %v487_v28  ;;  %v538_v20 = vld [vmem:[#allocation2 + $0xa10] sm:$0xff] }
 0x1ad   : > { %3734 = vmatpush1.bf16.msra.mxu0 %v4750_v58  ;;  %3906 = vmatpush1.bf16.msra.mxu1 %v4752_v34  ;;  %v4817_v58 = vcombine.high %v483_v26, %v487_v28  ;;  %v490_v34 = vld [vmem:[#allocation2 + $0x890] sm:$0xff] }
 0x1ae   : > { %3735 = vmatprep.subr.bf16.mxu0 %v4759_v35  ;;  %3907 = vmatprep.subr.bf16.mxu1 %v4761_v36  ;;  %v494_v35 = vld [vmem:[#allocation2 + $0x8b0] sm:$0xff]  ;;  %v491_v36 = vld [vmem:[#allocation2 + $0x898] sm:$0xff] }
 0x1af   : > { %v4823_v38 = vcombine.high %v490_v34, %v494_v35  ;;  %v4822_v47 = vcombine.low %v490_v34, %v494_v35  ;;  %v546_v28 = vld [vmem:[#allocation2 + $0xa50] sm:$0xff] }
 0x1b1   : > { %3736 = vmatpush1.bf16.msra.mxu0 %v4758_v39  ;;  %3908 = vmatpush1.bf16.msra.mxu1 %v4760_v40  ;;  %v4825_v39 = vcombine.high %v491_v36, %v495_v15  ;;  %v498_v40 = vld [vmem:[#allocation2 + $0x8d0] sm:$0xff] }
 0x1b2   : > { %3737 = vmatprep.subr.bf16.mxu0 %v4767_v41  ;;  %3909 = vmatprep.subr.bf16.mxu1 %v4769_v42  ;;  %v502_v41 = vld [vmem:[#allocation2 + $0x8f0] sm:$0xff]  ;;  %v499_v42 = vld [vmem:[#allocation2 + $0x8d8] sm:$0xff] }
 0x1b3   : > { %v4831_v53 = vcombine.high %v498_v40, %v502_v41  ;;  %v4833_v48 = vcombine.high %v499_v42, %v503_v44  ;;  %v4830_v29 = vcombine.low %v498_v40, %v502_v41  ;;  %v4832_v30 = vcombine.low %v499_v42, %v503_v44  ;;  %v562_v44 = vld [vmem:[#allocation2 + $0xad0] sm:$0xff] }
 0x1b5   : > { %3738 = vmatpush1.bf16.msra.mxu0 %v4766_v49  ;;  %3910 = vmatpush1.bf16.msra.mxu1 %v4768_v50  ;;  %v506_v49 = vld [vmem:[#allocation2 + $0x910] sm:$0xff] }
 0x1b6   : > { %3739 = vmatprep.subr.bf16.mxu0 %v4775_v51  ;;  %3911 = vmatprep.subr.bf16.mxu1 %v4777_v52  ;;  %v510_v50 = vld [vmem:[#allocation2 + $0x930] sm:$0xff]  ;;  %v507_v51 = vld [vmem:[#allocation2 + $0x918] sm:$0xff] }
 0x1b7   : > { %v511_v52 = vld [vmem:[#allocation2 + $0x938] sm:$0xff]  ;;  %v4839_v56 = vcombine.high %v506_v49, %v510_v50 }
 0x1b8   : > { %v4840_v63 = vcombine.low %v507_v51, %v511_v52 }
 0x1b9   : > { %3740 = vmatpush1.bf16.msra.mxu0 %v4774_v59  ;;  %3912 = vmatpush1.bf16.msra.mxu1 %v4776_v60  ;;  %v518_v59 = vld [vmem:[#allocation2 + $0x970] sm:$0xff]  ;;  %v515_v60 = vld [vmem:[#allocation2 + $0x958] sm:$0xff] }
 0x1ba   : > { %3741 = vmatprep.subr.bf16.mxu0 %v4783_v61  ;;  %3913 = vmatprep.subr.bf16.mxu1 %v4785_v62  ;;  %v519_v61 = vld [vmem:[#allocation2 + $0x978] sm:$0xff]  ;;  %v4838_v62 = vcombine.low %v506_v49, %v510_v50  ;;  %v4847_v0 = vcombine.high %v514_v57, %v518_v59 }
 0x1bb   : > { %v4849_v2 = vcombine.high %v515_v60, %v519_v61  ;;  %v4848_v8 = vcombine.low %v515_v60, %v519_v61  ;;  %v578_v61 = vld [vmem:[#allocation2 + $0xb50] sm:$0xff] }
 0x1bd   : > { %3742 = vmatpush1.bf16.msra.mxu0 %v4782_v4  ;;  %3914 = vmatpush1.bf16.msra.mxu1 %v4784_v5  ;;  %v526_v4 = vld [vmem:[#allocation2 + $0x9b0] sm:$0xff]  ;;  %v523_v5 = vld [vmem:[#allocation2 + $0x998] sm:$0xff] }
 0x1be   : > { %3743 = vmatprep.subr.bf16.mxu0 %v4791_v6  ;;  %3915 = vmatprep.subr.bf16.mxu1 %v4793_v7  ;;  %v527_v6 = vld [vmem:[#allocation2 + $0x9b8] sm:$0xff]  ;;  %v4846_v7 = vcombine.low %v514_v57, %v518_v59  ;;  %v4855_v9 = vcombine.high %v522_v3, %v526_v4 }
 0x1bf   : > { %v4857_v10 = vcombine.high %v523_v5, %v527_v6  ;;  %v4856_v14 = vcombine.low %v523_v5, %v527_v6  ;;  %v586_v6 = vld [vmem:[#allocation2 + $0xb90] sm:$0xff] }
 0x1c1   : > { %3744 = vmatpush1.bf16.msra.mxu0 %v4790_v45  ;;  %3916 = vmatpush1.bf16.msra.mxu1 %v4792_v46  ;;  %v534_v45 = vld [vmem:[#allocation2 + $0x9f0] sm:$0xff]  ;;  %v531_v46 = vld [vmem:[#allocation2 + $0x9d8] sm:$0xff] }
 0x1c2   : > { %3745 = vmatprep.subr.bf16.mxu0 %v4799_v12  ;;  %3917 = vmatprep.subr.bf16.mxu1 %v4801_v13  ;;  %v535_v12 = vld [vmem:[#allocation2 + $0x9f8] sm:$0xff]  ;;  %v4854_v13 = vcombine.low %v522_v3, %v526_v4  ;;  %v4863_v16 = vcombine.high %v530_v11, %v534_v45 }
 0x1c3   : > { %v4865_v19 = vcombine.high %v531_v46, %v535_v12  ;;  %v4864_v25 = vcombine.low %v531_v46, %v535_v12  ;;  %v594_v12 = vld [vmem:[#allocation2 + $0xbd0] sm:$0xff] }
 0x1c5   : > { %3746 = vmatpush1.bf16.msra.mxu0 %v4798_v21  ;;  %3918 = vmatpush1.bf16.msra.mxu1 %v4800_v22  ;;  %v542_v21 = vld [vmem:[#allocation2 + $0xa30] sm:$0xff]  ;;  %v539_v22 = vld [vmem:[#allocation2 + $0xa18] sm:$0xff] }
 0x1c6   : > { %3758 = vmatprep.subr.bf16.mxu0 %v4807_v23  ;;  %3930 = vmatprep.subr.bf16.mxu1 %v4809_v24  ;;  %v543_v23 = vld [vmem:[#allocation2 + $0xa38] sm:$0xff]  ;;  %v4862_v24 = vcombine.low %v530_v11, %v534_v45  ;;  %v4871_v54 = vcombine.high %v538_v20, %v542_v21 }
 0x1c7   : > { %v4873_v26 = vcombine.high %v539_v22, %v543_v23  ;;  %v4872_v34 = vcombine.low %v539_v22, %v543_v23  ;;  %v602_v23 = vld [vmem:[#allocation2 + $0xc10] sm:$0xff] }
 0x1c8   : > { %3748 = vmatmul.mubr.bf16.vlgmr.msra.gmra.mrb[4].mxu0 %v5495_v27  ;;  %3920 = vmatmul.mubr.bf16.vlgmr.msra.gmra.mrb[4].mxu1 %v5495_v27  ;;  %v4824_v27 = vcombine.low %v491_v36, %v495_v15  ;;  %v554_v15 = vld [vmem:[#allocation2 + $0xa90] sm:$0xff] }
 0x1c9   : > { %3759 = vmatpush1.bf16.msra.mxu0 %v4806_v31  ;;  %3931 = vmatpush1.bf16.msra.mxu1 %v4808_v32  ;;  %v550_v31 = vld [vmem:[#allocation2 + $0xa70] sm:$0xff]  ;;  %v547_v32 = vld [vmem:[#allocation2 + $0xa58] sm:$0xff] }
 0x1ca   : > { %3760 = vmatprep.subr.bf16.mxu0 %v4815_v33  ;;  %3932 = vmatprep.subr.bf16.mxu1 %v4817_v58  ;;  %v551_v33 = vld [vmem:[#allocation2 + $0xa78] sm:$0xff]  ;;  %v4870_v58 = vcombine.low %v538_v20, %v542_v21  ;;  %v4879_v35 = vcombine.high %v546_v28, %v550_v31 }
 0x1cb   : > { %3790 = vmatprep.mubr.bf16.mxu0 %v5505_v37  ;;  %3962 = vmatprep.mubr.bf16.mxu1 %v5505_v37  ;;  %v4841_v37 = vcombine.high %v507_v51, %v511_v52  ;;  %v4881_v36 = vcombine.high %v547_v32, %v551_v33  ;;  %v4880_v40 = vcombine.low %v547_v32, %v551_v33  ;;  %v570_v52 = vld [vmem:[#allocation2 + $0xb10] sm:$0xff] }
 0x1cc   : > { %v610_v33 = vld [vmem:[#allocation2 + $0xc50] sm:$0xff] }
 0x1cd   : > { %3761 = vmatpush1.bf16.msra.mxu0 %v4814_v17  ;;  %3933 = vmatpush1.bf16.msra.mxu1 %v4816_v18  ;;  %v558_v17 = vld [vmem:[#allocation2 + $0xab0] sm:$0xff]  ;;  %v555_v18 = vld [vmem:[#allocation2 + $0xa98] sm:$0xff] }
 0x1ce   : > { %3762 = vmatprep.subr.bf16.mxu0 %v4823_v38  ;;  %3934 = vmatprep.subr.bf16.mxu1 %v4825_v39  ;;  %v559_v38 = vld [vmem:[#allocation2 + $0xab8] sm:$0xff]  ;;  %v4878_v39 = vcombine.low %v546_v28, %v550_v31  ;;  %v4887_v41 = vcombine.high %v554_v15, %v558_v17 }
 0x1cf   : > { %v4889_v42 = vcombine.high %v555_v18, %v559_v38  ;;  %v4888_v49 = vcombine.low %v555_v18, %v559_v38  ;;  %v618_v38 = vld [vmem:[#allocation2 + $0xc90] sm:$0xff] }
 0x1d1   : > { %3763 = vmatpush1.bf16.msra.mxu0 %v4822_v47  ;;  %3935 = vmatpush1.bf16.msra.mxu1 %v4824_v27  ;;  %v566_v47 = vld [vmem:[#allocation2 + $0xaf0] sm:$0xff]  ;;  %v563_v27 = vld [vmem:[#allocation2 + $0xad8] sm:$0xff] }
 0x1d2   : > { %3764 = vmatprep.subr.bf16.mxu0 %v4831_v53  ;;  %3936 = vmatprep.subr.bf16.mxu1 %v4833_v48  ;;  %v567_v53 = vld [vmem:[#allocation2 + $0xaf8] sm:$0xff]  ;;  %v4886_v48 = vcombine.low %v554_v15, %v558_v17  ;;  %v4895_v50 = vcombine.high %v562_v44, %v566_v47 }
 0x1d3   : > { %v4897_v51 = vcombine.high %v563_v27, %v567_v53  ;;  %v4896_v57 = vcombine.low %v563_v27, %v567_v53  ;;  %v626_v53 = vld [vmem:[#allocation2 + $0xcd0] sm:$0xff] }
 0x1d5   : > { %3765 = vmatpush1.bf16.msra.mxu0 %v4830_v29  ;;  %3937 = vmatpush1.bf16.msra.mxu1 %v4832_v30  ;;  %v574_v29 = vld [vmem:[#allocation2 + $0xb30] sm:$0xff]  ;;  %v571_v30 = vld [vmem:[#allocation2 + $0xb18] sm:$0xff] }
 0x1d6   : > { %3766 = vmatprep.subr.bf16.mxu0 %v4839_v56  ;;  %3938 = vmatprep.subr.bf16.mxu1 %v4841_v37  ;;  %v575_v56 = vld [vmem:[#allocation2 + $0xb38] sm:$0xff]  ;;  %v4894_v37 = vcombine.low %v562_v44, %v566_v47  ;;  %v4903_v59 = vcombine.high %v570_v52, %v574_v29 }
 0x1d7   : > { %v4905_v60 = vcombine.high %v571_v30, %v575_v56  ;;  %v4904_v3 = vcombine.low %v571_v30, %v575_v56  ;;  %v634_v30 = vld [vmem:[#allocation2 + $0xd10] sm:$0xff] }
 0x1d8   : > { %v638_v56 = vld [vmem:[#allocation2 + $0xd30] sm:$0xff] }
 0x1d9   : > { %3767 = vmatpush1.bf16.msra.mxu0 %v4838_v62  ;;  %3939 = vmatpush1.bf16.msra.mxu1 %v4840_v63  ;;  %v582_v62 = vld [vmem:[#allocation2 + $0xb70] sm:$0xff]  ;;  %v579_v63 = vld [vmem:[#allocation2 + $0xb58] sm:$0xff] }
 0x1da   : > { %3768 = vmatprep.subr.bf16.mxu0 %v4847_v0  ;;  %3940 = vmatprep.subr.bf16.mxu1 %v4849_v2  ;;  %v583_v0 = vld [vmem:[#allocation2 + $0xb78] sm:$0xff]  ;;  %v4902_v2 = vcombine.low %v570_v52, %v574_v29  ;;  %v4911_v4 = vcombine.high %v578_v61, %v582_v62 }
 0x1db   : > { %v4913_v5 = vcombine.high %v579_v63, %v583_v0  ;;  %v4912_v11 = vcombine.low %v579_v63, %v583_v0  ;;  %v646_v63 = vld [vmem:[#allocation2 + $0xd70] sm:$0xff]  ;;  %v643_v0 = vld [vmem:[#allocation2 + $0xd58] sm:$0xff] }
 0x1dd   : > { %3769 = vmatpush1.bf16.msra.mxu0 %v4846_v7  ;;  %3941 = vmatpush1.bf16.msra.mxu1 %v4848_v8  ;;  %v590_v7 = vld [vmem:[#allocation2 + $0xbb0] sm:$0xff]  ;;  %v587_v8 = vld [vmem:[#allocation2 + $0xb98] sm:$0xff] }
 0x1de   : > { %3770 = vmatprep.subr.bf16.mxu0 %v4855_v9  ;;  %3942 = vmatprep.subr.bf16.mxu1 %v4857_v10  ;;  %v591_v9 = vld [vmem:[#allocation2 + $0xbb8] sm:$0xff]  ;;  %v4910_v10 = vcombine.low %v578_v61, %v582_v62  ;;  %v4919_v45 = vcombine.high %v586_v6, %v590_v7  ;;  %v4967_v61 = vcombine.high %v634_v30, %v638_v56  ;;  %v642_v62 = vld [vmem:[#allocation2 + $0xd50] sm:$0xff] }
 0x1df   : > { %v4921_v46 = vcombine.high %v587_v8, %v591_v9  ;;  %v4920_v20 = vcombine.low %v587_v8, %v591_v9  ;;  %v654_v8 = vld [vmem:[#allocation2 + $0xdb0] sm:$0xff]  ;;  %v651_v9 = vld [vmem:[#allocation2 + $0xd98] sm:$0xff] }
 0x1e1   : > { %3771 = vmatpush1.bf16.msra.mxu0 %v4854_v13  ;;  %3943 = vmatpush1.bf16.msra.mxu1 %v4856_v14  ;;  %v598_v13 = vld [vmem:[#allocation2 + $0xbf0] sm:$0xff]  ;;  %v595_v14 = vld [vmem:[#allocation2 + $0xbd8] sm:$0xff] }
 0x1e2   : > { %3772 = vmatprep.subr.bf16.mxu0 %v4863_v16  ;;  %3944 = vmatprep.subr.bf16.mxu1 %v4865_v19  ;;  %v599_v16 = vld [vmem:[#allocation2 + $0xbf8] sm:$0xff]  ;;  %v4918_v19 = vcombine.low %v586_v6, %v590_v7  ;;  %v4927_v21 = vcombine.high %v594_v12, %v598_v13  ;;  %v650_v7 = vld [vmem:[#allocation2 + $0xd90] sm:$0xff] }
 0x1e3   : > { %v4929_v22 = vcombine.high %v595_v14, %v599_v16  ;;  %v4928_v28 = vcombine.low %v595_v14, %v599_v16  ;;  %v658_v14 = vld [vmem:[#allocation2 + $0xdd0] sm:$0xff] }
 0x1e4   : > { %v662_v16 = vld [vmem:[#allocation2 + $0xdf0] sm:$0xff] }
 0x1e5   : > { %3773 = vmatpush1.bf16.msra.mxu0 %v4862_v24  ;;  %3945 = vmatpush1.bf16.msra.mxu1 %v4864_v25  ;;  %v606_v24 = vld [vmem:[#allocation2 + $0xc30] sm:$0xff]  ;;  %v603_v25 = vld [vmem:[#allocation2 + $0xc18] sm:$0xff] }
 0x1e6   : > { %3774 = vmatprep.subr.bf16.mxu0 %v4871_v54  ;;  %3946 = vmatprep.subr.bf16.mxu1 %v4873_v26  ;;  %v607_v54 = vld [vmem:[#allocation2 + $0xc38] sm:$0xff]  ;;  %v4926_v26 = vcombine.low %v594_v12, %v598_v13  ;;  %v4935_v31 = vcombine.high %v602_v23, %v606_v24 }
 0x1e7   : > { %v4937_v32 = vcombine.high %v603_v25, %v607_v54  ;;  %v4936_v15 = vcombine.low %v603_v25, %v607_v54  ;;  %v4982_v25 = vcombine.low %v650_v7, %v654_v8 }
 0x1e9   : > { %3775 = vmatpush1.bf16.msra.mxu0 %v4870_v58  ;;  %3947 = vmatpush1.bf16.msra.mxu1 %v4872_v34  ;;  %v614_v58 = vld [vmem:[#allocation2 + $0xc70] sm:$0xff]  ;;  %v611_v34 = vld [vmem:[#allocation2 + $0xc58] sm:$0xff] }
 0x1ea   : > { %3776 = vmatprep.subr.bf16.mxu0 %v4879_v35  ;;  %3948 = vmatprep.subr.bf16.mxu1 %v4881_v36  ;;  %v615_v35 = vld [vmem:[#allocation2 + $0xc78] sm:$0xff]  ;;  %v4934_v36 = vcombine.low %v602_v23, %v606_v24  ;;  %v4943_v17 = vcombine.high %v610_v33, %v614_v58 }
 0x1eb   : > { %v4945_v18 = vcombine.high %v611_v34, %v615_v35  ;;  %v4944_v44 = vcombine.low %v611_v34, %v615_v35  ;;  %v670_v34 = vld [vmem:[#allocation2 + $0xe30] sm:$0xff]  ;;  %v667_v35 = vld [vmem:[#allocation2 + $0xe18] sm:$0xff] }
 0x1ed   : > { %3777 = vmatpush1.bf16.msra.mxu0 %v4878_v39  ;;  %3949 = vmatpush1.bf16.msra.mxu1 %v4880_v40  ;;  %v622_v39 = vld [vmem:[#allocation2 + $0xcb0] sm:$0xff]  ;;  %v619_v40 = vld [vmem:[#allocation2 + $0xc98] sm:$0xff] }
 0x1ee   : > { %3778 = vmatprep.subr.bf16.mxu0 %v4887_v41  ;;  %3950 = vmatprep.subr.bf16.mxu1 %v4889_v42  ;;  %v623_v41 = vld [vmem:[#allocation2 + $0xcb8] sm:$0xff]  ;;  %v4942_v42 = vcombine.low %v610_v33, %v614_v58  ;;  %v4951_v47 = vcombine.high %v618_v38, %v622_v39  ;;  %v666_v58 = vld [vmem:[#allocation2 + $0xe10] sm:$0xff] }
 0x1ef   : > { %v4953_v27 = vcombine.high %v619_v40, %v623_v41 }
 0x1f1   : > { %3779 = vmatpush1.bf16.msra.mxu0 %v4886_v48  ;;  %3951 = vmatpush1.bf16.msra.mxu1 %v4888_v49  ;;  %v630_v48 = vld [vmem:[#allocation2 + $0xcf0] sm:$0xff]  ;;  %v627_v49 = vld [vmem:[#allocation2 + $0xcd8] sm:$0xff] }
 0x1f2   : > { %3780 = vmatprep.subr.bf16.mxu0 %v4895_v50  ;;  %3952 = vmatprep.subr.bf16.mxu1 %v4897_v51  ;;  %v631_v50 = vld [vmem:[#allocation2 + $0xcf8] sm:$0xff]  ;;  %v4950_v51 = vcombine.low %v618_v38, %v622_v39  ;;  %v4959_v52 = vcombine.high %v626_v53, %v630_v48  ;;  %v674_v39 = vld [vmem:[#allocation2 + $0xe50] sm:$0xff] }
 0x1f3   : > { %v4961_v29 = vcombine.high %v627_v49, %v631_v50 }
 0x1f5   : > { %3781 = vmatpush1.bf16.msra.mxu0 %v4894_v37  ;;  %3953 = vmatpush1.bf16.msra.mxu1 %v4896_v57  ;;  %v635_v37 = vld [vmem:[#allocation2 + $0xd18] sm:$0xff] }
 0x1f6   : > { %3782 = vmatprep.subr.bf16.mxu0 %v4903_v59  ;;  %3954 = vmatprep.subr.bf16.mxu1 %v4905_v60  ;;  %v639_v57 = vld [vmem:[#allocation2 + $0xd38] sm:$0xff]  ;;  %v4958_v59 = vcombine.low %v626_v53, %v630_v48  ;;  %v4960_v60 = vcombine.low %v627_v49, %v631_v50  ;;  %v682_v48 = vld [vmem:[#allocation2 + $0xe90] sm:$0xff] }
 0x1f7   : > { %v686_v49 = vld [vmem:[#allocation2 + $0xeb0] sm:$0xff]  ;;  %v683_v50 = vld [vmem:[#allocation2 + $0xe98] sm:$0xff] }
 0x1f9   : > { %3783 = vmatpush1.bf16.msra.mxu0 %v4902_v2  ;;  %3955 = vmatpush1.bf16.msra.mxu1 %v4904_v3  ;;  %v647_v2 = vld [vmem:[#allocation2 + $0xd78] sm:$0xff]  ;;  %v4966_v3 = vcombine.low %v634_v30, %v638_v56  ;;  %v690_v56 = vld [vmem:[#allocation2 + $0xed0] sm:$0xff] }
 0x1fa   : > { %3784 = vmatprep.subr.bf16.mxu0 %v4911_v4  ;;  %3956 = vmatprep.subr.bf16.mxu1 %v4913_v5  ;;  %v4968_v4 = vcombine.low %v635_v37, %v639_v57  ;;  %v4975_v5 = vcombine.high %v642_v62, %v646_v63  ;;  %v4977_v6 = vcombine.high %v643_v0, %v647_v2 }
 0x1fd   : > { %3785 = vmatpush1.bf16.msra.mxu0 %v4910_v10  ;;  %3957 = vmatpush1.bf16.msra.mxu1 %v4912_v11  ;;  %v655_v10 = vld [vmem:[#allocation2 + $0xdb8] sm:$0xff]  ;;  %v4974_v11 = vcombine.low %v642_v62, %v646_v63  ;;  %v698_v63 = vld [vmem:[#allocation2 + $0xf10] sm:$0xff] }
 0x1fe   : > { %3786 = vmatprep.subr.bf16.mxu0 %v4919_v45  ;;  %3958 = vmatprep.subr.bf16.mxu1 %v4921_v46  ;;  %v4976_v45 = vcombine.low %v643_v0, %v647_v2  ;;  %v4983_v46 = vcombine.high %v650_v7, %v654_v8  ;;  %v4985_v13 = vcombine.high %v651_v9, %v655_v10  ;;  %v702_v0 = vld [vmem:[#allocation2 + $0xf30] sm:$0xff]  ;;  %v699_v2 = vld [vmem:[#allocation2 + $0xf18] sm:$0xff] }
 0x1ff   : > { %v706_v8 = vld [vmem:[#allocation2 + $0xf50] sm:$0xff] }
 0x201   : > { %3787 = vmatpush1.bf16.msra.mxu0 %v4918_v19  ;;  %3959 = vmatpush1.bf16.msra.mxu1 %v4920_v20 }
 0x202   : > { %3788 = vmatprep.subr.bf16.mxu0 %v4927_v21  ;;  %3960 = vmatprep.subr.bf16.mxu1 %v4929_v22  ;;  %v659_v21 = vld [vmem:[#allocation2 + $0xdd8] sm:$0xff] }
 0x203   : > { %v663_v22 = vld [vmem:[#allocation2 + $0xdf8] sm:$0xff] }
 0x204   : > { %v4993_v33 = vcombine.high %v659_v21, %v663_v22 }
 0x205   : > { %3789 = vmatpush1.bf16.msra.mxu0 %v4926_v26  ;;  %3961 = vmatpush1.bf16.msra.mxu1 %v4928_v28  ;;  %v4984_v28 = vcombine.low %v651_v9, %v655_v10  ;;  %v710_v9 = vld [vmem:[#allocation2 + $0xf70] sm:$0xff]  ;;  %v707_v10 = vld [vmem:[#allocation2 + $0xf58] sm:$0xff] }
 0x206   : > { %3801 = vmatprep.subr.bf16.mxu0 %v4935_v31  ;;  %3973 = vmatprep.subr.bf16.mxu1 %v4937_v32  ;;  %v4991_v31 = vcombine.high %v658_v14, %v662_v16 }
 0x208   : > { %3791 = vmatmul.mubr.bf16.vlgmr.msra.gmra.mrb[4].mxu0 %v5513_v43  ;;  %3963 = vmatmul.mubr.bf16.vlgmr.msra.gmra.mrb[4].mxu1 %v5513_v43  ;;  %v4952_v43 = vcombine.low %v619_v40, %v623_v41  ;;  %v678_v40 = vld [vmem:[#allocation2 + $0xe70] sm:$0xff]  ;;  %v675_v41 = vld [vmem:[#allocation2 + $0xe58] sm:$0xff] }
 0x209   : > { %3802 = vmatpush1.bf16.msra.mxu0 %v4934_v36  ;;  %3974 = vmatpush1.bf16.msra.mxu1 %v4936_v15  ;;  %v671_v36 = vld [vmem:[#allocation2 + $0xe38] sm:$0xff]  ;;  %v4990_v15 = vcombine.low %v658_v14, %v662_v16  ;;  %v714_v16 = vld [vmem:[#allocation2 + $0xf90] sm:$0xff] }
 0x20a   : > { %3803 = vmatprep.subr.bf16.mxu0 %v4943_v17  ;;  %3975 = vmatprep.subr.bf16.mxu1 %v4945_v18  ;;  %v4992_v17 = vcombine.low %v659_v21, %v663_v22  ;;  %v4999_v18 = vcombine.high %v666_v58, %v670_v34  ;;  %v5001_v38 = vcombine.high %v667_v35, %v671_v36  ;;  %v718_v21 = vld [vmem:[#allocation2 + $0xfb0] sm:$0xff]  ;;  %v715_v22 = vld [vmem:[#allocation2 + $0xf98] sm:$0xff] }
 0x20b   : > { %3833 = vmatprep.mubr.bf16.mxu0 %v5523_v55  ;;  %4005 = vmatprep.mubr.bf16.mxu1 %v5523_v55  ;;  %v4969_v55 = vcombine.high %v635_v37, %v639_v57  ;;  %v694_v37 = vld [vmem:[#allocation2 + $0xef0] sm:$0xff]  ;;  %v691_v57 = vld [vmem:[#allocation2 + $0xed8] sm:$0xff] }
 0x20d   : > { %3804 = vmatpush1.bf16.msra.mxu0 %v4942_v42  ;;  %3976 = vmatpush1.bf16.msra.mxu1 %v4944_v44  ;;  %v679_v42 = vld [vmem:[#allocation2 + $0xe78] sm:$0xff]  ;;  %v4998_v44 = vcombine.low %v666_v58, %v670_v34  ;;  %v722_v34 = vld [vmem:[#allocation2 + $0xfd0] sm:$0xff] }
 0x20e   : > { %3805 = vmatprep.subr.bf16.mxu0 %v4951_v47  ;;  %3977 = vmatprep.subr.bf16.mxu1 %v4953_v27  ;;  %v5000_v47 = vcombine.low %v667_v35, %v671_v36  ;;  %v5007_v27 = vcombine.high %v674_v39, %v678_v40  ;;  %v5009_v53 = vcombine.high %v675_v41, %v679_v42  ;;  %v726_v35 = vld [vmem:[#allocation2 + $0xff0] sm:$0xff]  ;;  %v723_v36 = vld [vmem:[#allocation2 + $0xfd8] sm:$0xff] }
 0x211   : > { %3806 = vmatpush1.bf16.msra.mxu0 %v4950_v51  ;;  %3978 = vmatpush1.bf16.msra.mxu1 %v4952_v43  ;;  %v687_v51 = vld [vmem:[#allocation2 + $0xeb8] sm:$0xff]  ;;  %v5006_v43 = vcombine.low %v674_v39, %v678_v40  ;;  %v5054_v40 = vcombine.low %v722_v34, %v726_v35 }
 0x212   : > { %3807 = vmatprep.subr.bf16.mxu0 %v4959_v52  ;;  %3979 = vmatprep.subr.bf16.mxu1 %v4961_v29  ;;  %v5008_v52 = vcombine.low %v675_v41, %v679_v42  ;;  %v5015_v29 = vcombine.high %v682_v48, %v686_v49  ;;  %v5017_v30 = vcombine.high %v683_v50, %v687_v51  ;;  %v5218_v42 = vld [vmem:[#allocation4 + $0x40] sm:$0xff]  }
 0x215   : > { %3808 = vmatpush1.bf16.msra.mxu0 %v4958_v59  ;;  %3980 = vmatpush1.bf16.msra.mxu1 %v4960_v60  ;;  %v695_v59 = vld [vmem:[#allocation2 + $0xef8] sm:$0xff]  ;;  %v5014_v60 = vcombine.low %v682_v48, %v686_v49  ;;  %v5223_v48 = vld [vmem:[#allocation4 + $0xc8] sm:$0xff]  }
 0x216   : > { %3809 = vmatprep.subr.bf16.mxu0 %v4967_v61  ;;  %3981 = vmatprep.subr.bf16.mxu1 %v4969_v55  ;;  %v5016_v61 = vcombine.low %v683_v50, %v687_v51  ;;  %v5023_v55 = vcombine.high %v690_v56, %v694_v37  ;;  %v5025_v62 = vcombine.high %v691_v57, %v695_v59  ;;  %v5224_v49 = vld [vmem:[#allocation4 + $0x8] sm:$0xff]   ;;  %v5226_v51 = vld [vmem:[#allocation4 + $0x50] sm:$0xff]  }
 0x217   : > { %v5225_v50 = vld [vmem:[#allocation4 + $0x88] sm:$0xff]  }
 0x219   : > { %3810 = vmatpush1.bf16.msra.mxu0 %v4966_v3  ;;  %3982 = vmatpush1.bf16.msra.mxu1 %v4968_v4  ;;  %v703_v3 = vld [vmem:[#allocation2 + $0xf38] sm:$0xff]  ;;  %v5022_v4 = vcombine.low %v690_v56, %v694_v37 }
 0x21a   : > { %3811 = vmatprep.subr.bf16.mxu0 %v4975_v5  ;;  %3983 = vmatprep.subr.bf16.mxu1 %v4977_v6  ;;  %v5024_v5 = vcombine.low %v691_v57, %v695_v59  ;;  %v5031_v6 = vcombine.high %v698_v63, %v702_v0  ;;  %v5033_v7 = vcombine.high %v699_v2, %v703_v3  ;;  %v5231_v56 = vld [vmem:[#allocation4 + $0xd8] sm:$0xff]   ;;  %v5234_v57 = vld [vmem:[#allocation4 + $0x60] sm:$0xff]  }
 0x21b   : > { %v5549_v12 = vpop.f32.mrb[0].mxu0  ;;  %v5551_v19 = vpop.f32.mrb[0].mxu1  ;;  %v5232_v37 = vld [vmem:[#allocation4 + $0x18] sm:$0xff]   ;;  %v5235_v59 = vld [vmem:[#allocation4 + $0xe0] sm:$0xff]  }
 0x21c   : > { %v5553_v20 = vpop.f32.mrb[1].mxu0  ;;  %v5555_v23 = vpop.f32.mrb[1].mxu1 }
 0x21d   : > { %v5557_v24 = vpop.f32.mrb[2].mxu0  ;;  %3812 = vmatpush1.bf16.msra.mxu0 %v4974_v11  ;;  %v5559_v54 = vpop.f32.mrb[2].mxu1  ;;  %3984 = vmatpush1.bf16.msra.mxu1 %v4976_v45  ;;  %v711_v11 = vld [vmem:[#allocation2 + $0xf78] sm:$0xff]  ;;  %v5030_v45 = vcombine.low %v698_v63, %v702_v0  ;;  %v5240_v63 = vld [vmem:[#allocation4 + $0x28] sm:$0xff]  }
 0x21e   : > { %v5561_v26 = vpop.f32.mrb[3].mxu0  ;;  %3813 = vmatprep.subr.bf16.mxu0 %v4983_v46  ;;  %v5563_v32 = vpop.f32.mrb[3].mxu1  ;;  %3985 = vmatprep.subr.bf16.mxu1 %v4985_v13  ;;  %v5032_v46 = vcombine.low %v699_v2, %v703_v3  ;;  %v5039_v13 = vcombine.high %v706_v8, %v710_v9  ;;  %v5041_v14 = vcombine.high %v707_v10, %v711_v11  ;;  %v5241_v0 = vld [vmem:[#allocation4 + $0xa8] sm:$0xff]   ;;  %v5242_v2 = vld [vmem:[#allocation4 + $0x70] sm:$0xff]  }
 0x21f   : > { %v5243_v3 = vld [vmem:[#allocation4 + $0xf0] sm:$0xff]  }
 0x221   : > { %3814 = vmatpush1.bf16.msra.mxu0 %v4982_v25  ;;  %3986 = vmatpush1.bf16.msra.mxu1 %v4984_v28  ;;  %v719_v25 = vld [vmem:[#allocation2 + $0xfb8] sm:$0xff]  ;;  %v5038_v28 = vcombine.low %v706_v8, %v710_v9 }
 0x222   : > { %3815 = vmatprep.subr.bf16.mxu0 %v4991_v31  ;;  %3987 = vmatprep.subr.bf16.mxu1 %v4993_v33  ;;  %v5040_v31 = vcombine.low %v707_v10, %v711_v11  ;;  %v5047_v33 = vcombine.high %v714_v16, %v718_v21  ;;  %v5049_v58 = vcombine.high %v715_v22, %v719_v25  ;;  %v5248_v8 = vld [vmem:[#allocation4 + $0x38] sm:$0xff]  }
 0x223   : > { %v5249_v9 = vld [vmem:[#allocation4 + $0xb8] sm:$0xff]   ;;  %v4016_v10 = vmul.f32 %v5549_v12, %v5549_v12  ;;  %v4018_v11 = vmul.f32 %v5551_v19, %v5551_v19  ;;  %v4021_v12 = vmul.f32 %v5561_v26, %v5561_v26 }
 0x225   : > { %3816 = vmatpush1.bf16.msra.mxu0 %v4990_v15  ;;  %3988 = vmatpush1.bf16.msra.mxu1 %v4992_v17  ;;  %v727_v15 = vld [vmem:[#allocation2 + $0xff8] sm:$0xff]  ;;  %v5046_v17 = vcombine.low %v714_v16, %v718_v21 }
 0x226   : > { %3817 = vmatprep.subr.bf16.mxu0 %v4999_v18  ;;  %3989 = vmatprep.subr.bf16.mxu1 %v5001_v38  ;;  %v5048_v18 = vcombine.low %v715_v22, %v719_v25  ;;  %v5055_v38 = vcombine.high %v722_v34, %v726_v35  ;;  %v5057_v39 = vcombine.high %v723_v36, %v727_v15 }
 0x227   : > { %v5056_v41 = vcombine.low %v723_v36, %v727_v15  ;;  %v4022_v25 = vmul.f32 %v5559_v54, %v5559_v54 }
 0x229   : > { %3818 = vmatpush1.bf16.msra.mxu0 %v4998_v44  ;;  %3990 = vmatpush1.bf16.msra.mxu1 %v5000_v47  ;;  %v5219_v44 = vld [vmem:[#allocation4 + $0xc0] sm:$0xff]  }
 0x22a   : > { %3819 = vmatprep.subr.bf16.mxu0 %v5007_v27  ;;  %3991 = vmatprep.subr.bf16.mxu1 %v5009_v53  ;;  %v5220_v47 = vld [vmem:[#allocation4] sm:$0xff]   ;;  %v5222_v53 = vld [vmem:[#allocation4 + $0x48] sm:$0xff]  }
 0x22b   : > { %v5221_v27 = vld [vmem:[#allocation4 + $0x80] sm:$0xff]  }
 0x22d   : > { %3820 = vmatpush1.bf16.msra.mxu0 %v5006_v43  ;;  %3992 = vmatpush1.bf16.msra.mxu1 %v5008_v52  ;;  %v5227_v43 = vld [vmem:[#allocation4 + $0xd0] sm:$0xff]  }
 0x22e   : > { %3821 = vmatprep.subr.bf16.mxu0 %v5015_v29  ;;  %3993 = vmatprep.subr.bf16.mxu1 %v5017_v30  ;;  %v5228_v52 = vld [vmem:[#allocation4 + $0x10] sm:$0xff]   ;;  %v5230_v30 = vld [vmem:[#allocation4 + $0x58] sm:$0xff]  }
 0x22f   : > { %v5229_v29 = vld [vmem:[#allocation4 + $0x90] sm:$0xff]  }
 0x231   : > { %3822 = vmatpush1.bf16.msra.mxu0 %v5014_v60  ;;  %3994 = vmatpush1.bf16.msra.mxu1 %v5016_v61  ;;  %v5236_v60 = vld [vmem:[#allocation4 + $0x20] sm:$0xff]  }
 0x232   : > { %3823 = vmatprep.subr.bf16.mxu0 %v5023_v55  ;;  %3995 = vmatprep.subr.bf16.mxu1 %v5025_v62  ;;  %v5237_v61 = vld [vmem:[#allocation4 + $0xa0] sm:$0xff]   ;;  %v5238_v55 = vld [vmem:[#allocation4 + $0x68] sm:$0xff]  }
 0x233   : > { %v5239_v62 = vld [vmem:[#allocation4 + $0xe8] sm:$0xff]  }
 0x235   : > { %3824 = vmatpush1.bf16.msra.mxu0 %v5022_v4  ;;  %3996 = vmatpush1.bf16.msra.mxu1 %v5024_v5  ;;  %v5244_v4 = vld [vmem:[#allocation4 + $0x30] sm:$0xff]  }
 0x236   : > { %3825 = vmatprep.subr.bf16.mxu0 %v5031_v6  ;;  %3997 = vmatprep.subr.bf16.mxu1 %v5033_v7  ;;  %v5245_v5 = vld [vmem:[#allocation4 + $0xb0] sm:$0xff]   ;;  %v5246_v6 = vld [vmem:[#allocation4 + $0x78] sm:$0xff]  }
 0x237   : > { %v5247_v7 = vld [vmem:[#allocation4 + $0xf8] sm:$0xff]  }
 0x239   : > { %3826 = vmatpush1.bf16.msra.mxu0 %v5030_v45  ;;  %3998 = vmatpush1.bf16.msra.mxu1 %v5032_v46  ;;  %v4017_v46 = vmul.f32 %v5553_v20, %v5553_v20  ;;  %v4023_v20 = vmul.f32 %v5563_v32, %v5563_v32 }
 0x23a   : > { %3827 = vmatprep.subr.bf16.mxu0 %v5039_v13  ;;  %3999 = vmatprep.subr.bf16.mxu1 %v5041_v14  ;;  %v4019_v13 = vmul.f32 %v5555_v23, %v5555_v23  ;;  %v4020_v14 = vmul.f32 %v5557_v24, %v5557_v24 }
 0x23d   : > { %3828 = vmatpush1.bf16.msra.mxu0 %v5038_v28  ;;  %4000 = vmatpush1.bf16.msra.mxu1 %v5040_v31 }
 0x23e   : > { %3829 = vmatprep.subr.bf16.mxu0 %v5047_v33  ;;  %4001 = vmatprep.subr.bf16.mxu1 %v5049_v58 }
 0x241   : > { %3830 = vmatpush1.bf16.msra.mxu0 %v5046_v17  ;;  %4002 = vmatpush1.bf16.msra.mxu1 %v5048_v18 }
 0x242   : > { %3831 = vmatprep.subr.bf16.mxu0 %v5055_v38  ;;  %4003 = vmatprep.subr.bf16.mxu1 %v5057_v39 }
 0x245   : > { %3832 = vmatpush1.bf16.msra.mxu0 %v5054_v40  ;;  %4004 = vmatpush1.bf16.msra.mxu1 %v5056_v41 }
 0x246   : > { %5093 = vmatprep.subr.bf16.mxu0 %v5218_v42  ;;  %5115 = vmatprep.subr.bf16.mxu1 %v5219_v44 }
 0x248   : > { %3834 = vmatmul.mubr.bf16.vlgmr.msra.gmra.mrb[4].mxu0 %v5531_v1  ;;  %4006 = vmatmul.mubr.bf16.vlgmr.msra.gmra.mrb[4].mxu1 %v5531_v1  ;;  %v5233_v1 = vld [vmem:[#allocation4 + $0x98] sm:$0xff]  }
 0x249   : > { %5094 = vmatpush3.bf16.msra.mxu0 %v5220_v47  ;;  %5116 = vmatpush3.bf16.msra.mxu1 %v5221_v27 }
 0x24a   : > { %5095 = vmatprep.subr.bf16.mxu0 %v5222_v53  ;;  %5117 = vmatprep.subr.bf16.mxu1 %v5223_v48 }
 0x24d   : > { %5096 = vmatpush3.bf16.msra.mxu0 %v5224_v49  ;;  %5118 = vmatpush3.bf16.msra.mxu1 %v5225_v50 }
 0x24e   : > { %5097 = vmatprep.subr.bf16.mxu0 %v5226_v51  ;;  %5119 = vmatprep.subr.bf16.mxu1 %v5227_v43 }
 0x251   : > { %5098 = vmatpush3.bf16.msra.mxu0 %v5228_v52  ;;  %5120 = vmatpush3.bf16.msra.mxu1 %v5229_v29 }
 0x252   : > { %5099 = vmatprep.subr.bf16.mxu0 %v5230_v30  ;;  %5121 = vmatprep.subr.bf16.mxu1 %v5231_v56 }
 0x255   : > { %5100 = vmatpush3.bf16.msra.mxu0 %v5232_v37  ;;  %5122 = vmatpush3.bf16.msra.mxu1 %v5233_v1 }
 0x256   : > { %5101 = vmatprep.subr.bf16.mxu0 %v5234_v57  ;;  %5123 = vmatprep.subr.bf16.mxu1 %v5235_v59 }
 0x259   : > { %5102 = vmatpush3.bf16.msra.mxu0 %v5236_v60  ;;  %5124 = vmatpush3.bf16.msra.mxu1 %v5237_v61 }
 0x25a   : > { %5103 = vmatprep.subr.bf16.mxu0 %v5238_v55  ;;  %5125 = vmatprep.subr.bf16.mxu1 %v5239_v62 }
 0x25d   : > { %5104 = vmatpush3.bf16.msra.mxu0 %v5240_v63  ;;  %5126 = vmatpush3.bf16.msra.mxu1 %v5241_v0 }
 0x25e   : > { %5105 = vmatprep.subr.bf16.mxu0 %v5242_v2  ;;  %5127 = vmatprep.subr.bf16.mxu1 %v5243_v3 }
 0x261   : > { %5106 = vmatpush3.bf16.msra.mxu0 %v5244_v4  ;;  %5128 = vmatpush3.bf16.msra.mxu1 %v5245_v5 }
 0x262   : > { %5107 = vmatprep.subr.bf16.mxu0 %v5246_v6  ;;  %5129 = vmatprep.subr.bf16.mxu1 %v5247_v7 }
 0x265   : > { %5108 = vmatpush3.bf16.msra.mxu0 %v5248_v8  ;;  %5130 = vmatpush3.bf16.msra.mxu1 %v5249_v9 }
 0x31b   : > { %v3835_v45 = vpop.f32.mrb[4].mxu0  ;;  %v4007_v21 = vpop.f32.mrb[4].mxu1 }
 0x31c   : > { %v4024_v16 = vmul.f32 %v3835_v45, %v3835_v45  ;;  %v3837_v22 = vpop.f32.mrb[5].mxu0  ;;  %v4026_v19 = vmul.f32 %v4007_v21, %v4007_v21  ;;  %v4009_v31 = vpop.f32.mrb[5].mxu1 }
 0x31d   : > { %v4025_v28 = vmul.f32 %v3837_v22, %v3837_v22  ;;  %v3839_v33 = vpop.f32.mrb[6].mxu0  ;;  %v4027_v58 = vmul.f32 %v4009_v31, %v4009_v31  ;;  %v4011_v34 = vpop.f32.mrb[6].mxu1 }
 0x31e   : > { %v5583_v23 = vadd.f32 %v4024_v16, %v4016_v10  ;;  %v4028_v24 = vmul.f32 %v3839_v33, %v3839_v33  ;;  %v3841_v35 = vpop.f32.mrb[7].mxu0  ;;  %v5585_v36 = vadd.f32 %v4026_v19, %v4018_v11  ;;  %v4030_v54 = vmul.f32 %v4011_v34, %v4011_v34  ;;  %v4013_v26 = vpop.f32.mrb[7].mxu1 }
 0x31f   : > { %v5587_v15 = vadd.f32 %v4025_v28, %v4017_v46  ;;  %v4029_v17 = vmul.f32 %v3841_v35, %v3841_v35  ;;  %v5590_v18 = vadd.f32 %v4027_v58, %v4019_v13  ;;  %v4031_v39 = vmul.f32 %v4013_v26, %v4013_v26 }
 0x320   : > { %5250 = vrsqrt.f32 %v5583_v23  ;;  %v4036_v38 = vadd.f32 %v4028_v24, %v4020_v14  ;;  %v4038_v32 = vadd.f32 %v4030_v54, %v4022_v25  ;;  %vm4042_vm8 = vcmp.eq.f32.partialorder %v5583_v23, inf }
 0x321   : > { %5252 = vrsqrt.f32 %v5585_v36  ;;  %v5593_v40 = vadd.f32 %v4029_v17, %v4021_v12  ;;  %v5596_v41 = vadd.f32 %v4031_v39, %v4023_v20  ;;  %vm4049_vm0 = vcmp.eq.f32.partialorder %v5587_v15, inf }
 0x322   : > { %5254 = vrsqrt.f32 %v5587_v15  ;;  %v4052_v44 = vand.u32 2147483648, %v5587_v15  ;;  %vm4051_vm2 = vcmp.eq.f32.partialorder %v5587_v15, 0.0  ;;  %vm4063_vm4 = vcmp.eq.f32.partialorder %v5590_v18, inf }
 0x323   : > { %5256 = vrsqrt.f32 %v5590_v18  ;;  %vm4077_vm1 = vcmp.eq.f32.partialorder %v5593_v40, inf  ;;  %v4080_v47 = vand.u32 2147483648, %v5593_v40  ;;  %vm4079_vm3 = vcmp.eq.f32.partialorder %v5593_v40, 0.0 }
 0x324   : > { %5258 = vrsqrt.f32 %v4036_v38  ;;  %v4066_v53 = vand.u32 2147483648, %v5590_v18  ;;  %vm4091_vm5 = vcmp.eq.f32.partialorder %v5596_v41, inf  ;;  %vm4065_vm6 = vcmp.eq.f32.partialorder %v5590_v18, 0.0 }
 0x325   : > { %5260 = vrsqrt.f32 %v4038_v32  ;;  %vm4093_vm7 = vcmp.eq.f32.partialorder %v5596_v41, 0.0  ;;  %v4094_v50 = vand.u32 2147483648, %v5596_v41  ;;  %vm4044_vm9 = vcmp.eq.f32.partialorder %v5583_v23, 0.0 }
 0x326   : > { %5262 = vrsqrt.f32 %v5593_v40  ;;  %v4045_v29 = vand.u32 2147483648, %v5583_v23  ;;  %vm4070_vm10 = vcmp.eq.f32.partialorder %v4036_v38, inf  ;;  %vm4072_vm11 = vcmp.eq.f32.partialorder %v4036_v38, 0.0 }
 0x327   : > { %5264 = vrsqrt.f32 %v5596_v41  ;;  %v4073_v1 = vand.u32 2147483648, %v4036_v38  ;;  %vm4056_vm12 = vcmp.eq.f32.partialorder %v5585_v36, inf  ;;  %vm4058_vm13 = vcmp.eq.f32.partialorder %v5585_v36, 0.0 }
 0x328   : > { %v4059_v60 = vand.u32 2147483648, %v5585_v36  ;;  %vm4084_vm14 = vcmp.eq.f32.partialorder %v4038_v32, inf  ;;  %vm4086_vm15 = vcmp.eq.f32.partialorder %v4038_v32, 0.0  ;;  %v4087_v63 = vand.u32 2147483648, %v4038_v32 }
 0x32a   : > { %v5251_v42 = vpop.eup %5250 }
 0x32b   : > { %v5253_v27 = vpop.eup %5252  ;;  %v4041_v48 = vmul.f32 %v5251_v42, %v5583_v23 }
 0x32c   : > { %v5255_v49 = vpop.eup %5254  ;;  %v4055_v51 = vmul.f32 %v5253_v27, %v5585_v36 }
 0x32d   : > { %v5257_v43 = vpop.eup %5256  ;;  %v4048_v52 = vmul.f32 %v5255_v49, %v5587_v15  ;;  %v4043_v37 = vsel %vm4042_vm8, %v5583_v23, %v4041_v48 }
 0x32e   : > { %v5259_v30 = vpop.eup %5258  ;;  %v4062_v56 = vmul.f32 %v5257_v43, %v5590_v18  ;;  %v4057_v55 = vsel %vm4056_vm12, %v5585_v36, %v4055_v51  ;;  %v4046_v4 = vsel %vm4044_vm9, %v4045_v29, %v4043_v37 }
 0x32f   : > { %v5261_v57 = vpop.eup %5260  ;;  %v4069_v59 = vmul.f32 %v5259_v30, %v4036_v38  ;;  %v4050_v2 = vsel %vm4049_vm0, %v5587_v15, %v4048_v52  ;;  %v4060_v45 = vsel %vm4058_vm13, %v4059_v60, %v4057_v55 }
 0x330   : > { %v5263_v61 = vpop.eup %5262  ;;  %v4083_v62 = vmul.f32 %v5261_v57, %v4038_v32  ;;  %v4064_v6 = vsel %vm4063_vm4, %v5590_v18, %v4062_v56  ;;  %v4053_v13 = vsel %vm4051_vm2, %v4052_v44, %v4050_v2 }
 0x331   : > { %v5265_v0 = vpop.eup %5264  ;;  %v4076_v3 = vmul.f32 %v5263_v61, %v5593_v40  ;;  %v4071_v5 = vsel %vm4070_vm10, %v4036_v38, %v4069_v59  ;;  %v4067_v25 = vsel %vm4065_vm6, %v4066_v53, %v4064_v6 }
 0x332   : > { %v4090_v7 = vmul.f32 %v5265_v0, %v5596_v41  ;;  %v4074_v8 = vsel %vm4072_vm11, %v4073_v1, %v4071_v5  ;;  %v4085_v9 = vsel %vm4084_vm14, %v4038_v32, %v4083_v62 }
 0x333   : > { %v4078_v10 = vsel %vm4077_vm1, %v5593_v40, %v4076_v3  ;;  %v4096_v11 = vpack.c.bf16 %v4074_v8, %v4046_v4  ;;  %v4088_v46 = vsel %vm4086_vm15, %v4087_v63, %v4085_v9 }
 0x334   : > { %v4081_v14 = vsel %vm4079_vm3, %v4080_v47, %v4078_v10  ;;  %v4092_v16 = vsel %vm4091_vm5, %v5596_v41, %v4090_v7  ;;  %v4098_v21 = vpack.c.bf16 %v4088_v46, %v4060_v45 }
 0x335   : > { %v4097_v22 = vpack.c.bf16 %v4081_v14, %v4053_v13  ;;  %v4095_v12 = vsel %vm4093_vm7, %v4094_v50, %v4092_v16 }
 0x336   : > { %v4099_v19 = vpack.c.bf16 %v4095_v12, %v4067_v25 }
 0x337   : > { %4388 = vmatprep.mubr.bf16.mxu0 %v4097_v22 }
 0x338   : > { %4429 = vmatprep.mubr.bf16.mxu1 %v4099_v19  ;;  %4389 = vmatmul.mubr.bf16.vlgmr.msra.gmra.mrb[8].mxu0 %v4096_v11 }
 0x339   : > { %4430 = vmatmul.mubr.bf16.vlgmr.msra.gmra.mrb[8].mxu1 %v4098_v21 }
 0x40b   : > { %v5109_v28 = vpop.f32.mrb[8].mxu0 }
 0x40c   : > { %v5131_v31 = vpop.f32.mrb[8].mxu1  ;;  %v5110_v33 = vpop.f32.mrb[9].mxu0 }
 0x40d   : > { %v5111_v20 = vadd.f32 %v5110_v33, %v5109_v28  ;;  %v5132_v23 = vpop.f32.mrb[9].mxu1  ;;  %v5112_v58 = vpop.f32.mrb[10].mxu0 }
 0x40e   : > { %v5133_v24 = vadd.f32 %v5132_v23, %v5131_v31  ;;  %v5134_v34 = vpop.f32.mrb[10].mxu1  ;;  %v5113_v35 = vpop.f32.mrb[11].mxu0 }
 0x40f   : > { %v5114_v36 = vadd.f32 %v5113_v35, %v5112_v58  ;;  %v5135_v15 = vpop.f32.mrb[11].mxu1 }
 0x410   : > { %v4432_v54 = vadd.f32 %v5133_v24, %v5111_v20  ;;  %v5136_v17 = vadd.f32 %v5135_v15, %v5134_v34 }
 0x412   : > { %v4438_v26 = vmax.f32 %v4432_v54, 1e-05  ;;  %v4435_v18 = vadd.f32 %v5136_v17, %v5114_v36 }
 0x414   : > { %5266 = vlog2.f32 %v4438_v26  ;;  %v4439_v38 = vmax.f32 %v4435_v18, 1e-05 }
 0x416   : > { %5268 = vlog2.f32 %v4439_v38 }
 0x41e   : > { %v5267_v39 = vpop.eup %5266 }
 0x41f   : > { %v4441_v32 = vmul.f32 0.6931472, %v5267_v39 }
 0x420   : > { %v5269_v40 = vpop.eup %5268 }
 0x421   : > { %4444 = vst [vmem:[%s205_s27] sm:$0xff] %v4441_v32  ;;  %v4443_v41 = vmul.f32 0.6931472, %v5269_v40 }
 0x423   : > { %4445 = vst [vmem:[%s205_s27 + $0x8] sm:$0xff] %v4443_v41 }
 0x424 PF: > { %s15_s12 = sadd.s32 1, %s5340_s12  }
 0x425   : > { %p12_p2 = scmp.ge.s32.totalorder %s15_s12, 4  }
 0x427   :  { %14 = sbr.rel (!%p12_p2) target bundleno = 2 (0x2), region = 71 }
 0x42e   :  { %4468 = vsyncpa [#allocation3], 1 }
 0x42f   :  { %4470 = vsyncpa [#allocation3 + $0x1], 1 }
 0x430   :  { %4471 = vsyncpa [#allocation5], 1 }

</bundles_post_ra>
